<compile_context>
chip_gen: v5e
topology: v5e:2x2
jax: 0.10.0
libtpu: 0.0.40
codegen_flags: <defaults>
</compile_context>

<pallas_src>
import functools

import jax
import jax.numpy as jnp
from jax import lax
from jax.experimental import pallas as pl
from jax.experimental.pallas import tpu as pltpu


def bottleneck_kernel(xc_ref, xu_ref, xd_ref,
                      w1_ref, s1_ref, b1_ref,
                      w2_ref, s2_ref, b2_ref,
                      w3_ref, s3_ref, b3_ref,
                      o_ref, *, row_tile):
    """One grid step = one row tile of one image.

    xc_ref: (1, TH, W, Cin) f32  center row tile of x (also the residual)
    xu_ref: (1, 1, W, Cin)  f32  row above the tile (clamped at the top edge)
    xd_ref: (1, 1, W, Cin)  f32  row below the tile (clamped at the bottom edge)
    w1_ref: (Cin, P)   bf16      conv1 1x1 weight
    w2_ref: (9*P, P)   bf16      conv2 3x3 weight, rows ordered (ky, kx, cin)
    w3_ref: (P, Cout)  bf16      conv3 1x1 weight
    s*/b* : (1, C)     f32       folded BatchNorm scale / bias
    o_ref : (1, TH, W, Cout) f32 output row tile
    """
    TH = row_tile
    _, _, W, Cin = xc_ref.shape
    P = w1_ref.shape[1]
    Cout = w3_ref.shape[1]
    t = pl.program_id(1)
    T = pl.num_programs(1)

    # ---- conv1 (1x1) + BN1 + ReLU over TH+2 rows (2 recomputed halo rows) ----
    x_c = xc_ref[0]                                               # (TH, W, Cin)
    xh = jnp.concatenate([xu_ref[0], x_c, xd_ref[0]], axis=0)     # (TH+2, W, Cin)
    a = jnp.dot(xh.reshape((TH + 2) * W, Cin).astype(jnp.bfloat16),
                w1_ref[...], preferred_element_type=jnp.float32)  # ((TH+2)W, P)
    h1 = jnp.maximum(a * s1_ref[...] + b1_ref[...], 0.0)
    h1 = h1.reshape(TH + 2, W, P)

    # conv2's zero-pad rows at the image top/bottom: the halo rows must be
    # exactly zero there (not conv1 applied to a clamped x row).
    row = lax.broadcasted_iota(jnp.int32, (TH + 2, 1, 1), 0)
    h1 = jnp.where(jnp.logical_and(row == 0, t == 0), 0.0, h1)
    h1 = jnp.where(jnp.logical_and(row == TH + 1, t == T - 1), 0.0, h1)

    # ---- conv2 (3x3, stride=1, pad=1) + BN2 + ReLU ---------------------------
    # Width taps built in registers with rolls + tiny boundary masks (f32),
    # cast to bf16, concatenated along lanes (K = 3P), then the 3 row shifts
    # concatenated as well (K = 9P) for one MXU matmul.
    left = pltpu.roll(h1, shift=1, axis=1)                        # left[w]  = h1[w-1]
    right = pltpu.roll(h1, shift=W - 1, axis=1)                   # right[w] = h1[w+1]
    col = lax.broadcasted_iota(jnp.int32, (1, W, 1), 1)
    left = jnp.where(col == 0, 0.0, left)                         # zero pad w = -1
    right = jnp.where(col == W - 1, 0.0, right)                   # zero pad w = W
    tap = jnp.concatenate([left.astype(jnp.bfloat16),
                           h1.astype(jnp.bfloat16),
                           right.astype(jnp.bfloat16)], axis=-1)  # (TH+2, W, 3P)
    tap9 = jnp.concatenate([tap[0:TH], tap[1:TH + 1], tap[2:TH + 2]],
                           axis=-1)                               # (TH, W, 9P)
    h2 = jnp.dot(tap9.reshape(TH * W, 9 * P), w2_ref[...],
                 preferred_element_type=jnp.float32)              # (TH*W, P)
    h2 = jnp.maximum(h2 * s2_ref[...] + b2_ref[...], 0.0)

    # ---- conv3 (1x1) + BN3, identity residual, final ReLU --------------------
    h3 = jnp.dot(h2.astype(jnp.bfloat16), w3_ref[...],
                 preferred_element_type=jnp.float32)              # (TH*W, Cout)
    h3 = h3 * s3_ref[...] + b3_ref[...]
    out = h3.reshape(TH, W, Cout) + x_c
    o_ref[0] = jnp.maximum(out, 0.0)


def _pick_row_tile(h, target):
    th = min(target, h)
    while h % th:
        th -= 1
    return th


def _vmem_limit_bytes():
    # Generation-aware VMEM limit (~3/4 of capacity, capped), with a safe
    # fallback when hardware info is unavailable at trace time.
    try:
        cap = pltpu.get_tpu_info().vmem_capacity_bytes
        return int(min(cap * 3 // 4, 100 * 1024 * 1024))
    except Exception:
        return 32 * 1024 * 1024


def bottleneck_forward(x_nhwc, w1, s1, b1, w2, s2, b2, w3, s3, b3):
    N, H, W, Cin = x_nhwc.shape
    P = w1.shape[1]
    Cout = w3.shape[1]
    assert Cin == Cout, "identity residual requires inplanes == planes * 4"
    # TODO(synk): for layers where W is not a multiple of 8 (e.g. 28/14/7), pad
    # the width to avoid relayout copies around the (TH,W,C) <-> (TH*W,C) reshapes.

    TH = _pick_row_tile(H, target=16 if H >= 64 else 8)
    T = H // TH

    grid_spec = pltpu.PrefetchScalarGridSpec(
        num_scalar_prefetch=0,
        grid=(N, T),
        in_specs=[
            # center row tile (also residual)
            pl.BlockSpec((1, TH, W, Cin), lambda n, t: (n, t, 0, 0)),
            # single halo row above (clamped; zeroed post-BN at the top edge)
            pl.BlockSpec((1, 1, W, Cin),
                         lambda n, t: (n, jnp.maximum(t * TH - 1, 0), 0, 0)),
            # single halo row below (clamped; zeroed post-BN at the bottom edge)
            pl.BlockSpec((1, 1, W, Cin),
                         lambda n, t: (n, jnp.minimum(t * TH + TH, H - 1), 0, 0)),
            pl.BlockSpec((Cin, P), lambda n, t: (0, 0)),
            pl.BlockSpec((1, P), lambda n, t: (0, 0)),
            pl.BlockSpec((1, P), lambda n, t: (0, 0)),
            pl.BlockSpec((9 * P, P), lambda n, t: (0, 0)),
            pl.BlockSpec((1, P), lambda n, t: (0, 0)),
            pl.BlockSpec((1, P), lambda n, t: (0, 0)),
            pl.BlockSpec((P, Cout), lambda n, t: (0, 0)),
            pl.BlockSpec((1, Cout), lambda n, t: (0, 0)),
            pl.BlockSpec((1, Cout), lambda n, t: (0, 0)),
        ],
        out_specs=pl.BlockSpec((1, TH, W, Cout), lambda n, t: (n, t, 0, 0)),
    )

    flops = 2 * N * H * W * (Cin * P + 9 * P * P + P * Cout)
    bytes_accessed = int(
        x_nhwc.size * 4 * (1.0 + 2.0 / TH)      # tile + 2 halo rows re-read
        + N * H * W * Cout * 4                  # output write
        + (w1.size + w2.size + w3.size) * 2
        + (s1.size + b1.size + s2.size + b2.size + s3.size + b3.size) * 4)

    return pl.pallas_call(
        functools.partial(bottleneck_kernel, row_tile=TH),
        out_shape=jax.ShapeDtypeStruct((N, H, W, Cout), jnp.float32),
        grid_spec=grid_spec,
        compiler_params=pltpu.CompilerParams(
            dimension_semantics=("parallel", "parallel"),
            vmem_limit_bytes=_vmem_limit_bytes()),
        cost_estimate=pl.CostEstimate(flops=flops, transcendentals=0,
                                      bytes_accessed=bytes_accessed),
    )(x_nhwc, x_nhwc, x_nhwc, w1, s1, b1, w2, s2, b2, w3, s3, b3)


def bn_fold(gamma, beta, mean, var, eps=1e-5):
    scale = gamma / jnp.sqrt(var + eps)
    bias = beta - mean * scale
    return scale, bias


def reference_nchw(x, w1_t, bn1, w2_t, bn2, w3_t, bn3, eps=1e-5):
    """Pure-JAX f32 reference in PyTorch NCHW convention."""
    def bn(y, p):
        g, b, m, v = p
        g, b, m, v = (t.reshape(1, -1, 1, 1) for t in (g, b, m, v))
        return g * (y - m) / jnp.sqrt(v + eps) + b

    dn = ("NCHW", "OIHW", "NCHW")
    y = lax.conv_general_dilated(x, w1_t, (1, 1), "VALID", dimension_numbers=dn)
    y = jax.nn.relu(bn(y, bn1))
    y = lax.conv_general_dilated(y, w2_t, (1, 1), ((1, 1), (1, 1)),
                                 dimension_numbers=dn)
    y = jax.nn.relu(bn(y, bn2))
    y = lax.conv_general_dilated(y, w3_t, (1, 1), "VALID", dimension_numbers=dn)
    y = bn(y, bn3)
    return jax.nn.relu(y + x)


if __name__ == "__main__":
    # Small shapes consistent with the module: inplanes = planes * expansion so
    # the identity residual is valid (downsample=None, stride=1).
    N, inplanes, planes, H, W = 2, 16, 4, 16, 16
    Cout = planes * 4  # expansion = 4

    key = jax.random.PRNGKey(0)
    ks = jax.random.split(key, 16)

    # PyTorch-convention parameters (OIHW conv weights, BN params).
    w1_t = 0.1 * jax.random.normal(ks[0], (planes, inplanes, 1, 1), jnp.float32)
    w2_t = 0.1 * jax.random.normal(ks[1], (planes, planes, 3, 3), jnp.float32)
    w3_t = 0.1 * jax.random.normal(ks[2], (Cout, planes, 1, 1), jnp.float32)

    def bn_params(k, c):
        k1, k2, k3, k4 = jax.random.split(k, 4)
        gamma = 1.0 + 0.1 * jax.random.normal(k1, (c,), jnp.float32)
        beta = 0.1 * jax.random.normal(k2, (c,), jnp.float32)
        mean = 0.1 * jax.random.normal(k3, (c,), jnp.float32)
        var = 0.5 + jnp.abs(jax.random.normal(k4, (c,), jnp.float32))
        return gamma, beta, mean, var

    bn1 = bn_params(ks[3], planes)
    bn2 = bn_params(ks[4], planes)
    bn3 = bn_params(ks[5], Cout)

    # Input in PyTorch NCHW.
    x_nchw = jax.random.normal(ks[6], (N, inplanes, H, W), jnp.float32)

    # --- convert to kernel layouts (NHWC activations, matmul-ready weights) ---
    x_nhwc = jnp.transpose(x_nchw, (0, 2, 3, 1))                     # (N, H, W, Cin)
    w1 = jnp.transpose(w1_t[:, :, 0, 0]).astype(jnp.bfloat16)        # (Cin, P)
    # (ky, kx, cin, cout) -> (ky*3P + kx*P + cin, cout): matches tap9 ordering.
    w2 = (jnp.transpose(w2_t, (2, 3, 1, 0))
          .reshape(9 * planes, planes).astype(jnp.bfloat16))         # (9P, P)
    w3 = jnp.transpose(w3_t[:, :, 0, 0]).astype(jnp.bfloat16)        # (P, Cout)

    s1, b1 = bn_fold(*bn1)
    s2, b2 = bn_fold(*bn2)
    s3, b3 = bn_fold(*bn3)
    s1, b1 = s1.reshape(1, -1), b1.reshape(1, -1)
    s2, b2 = s2.reshape(1, -1), b2.reshape(1, -1)
    s3, b3 = s3.reshape(1, -1), b3.reshape(1, -1)

    out_nhwc = bottleneck_forward(x_nhwc, w1, s1, b1, w2, s2, b2, w3, s3, b3)
    out_nhwc = jax.block_until_ready(out_nhwc)
    out_nchw = jnp.transpose(out_nhwc, (0, 3, 1, 2))

    # Correctness check against the pure-JAX f32 reference (tolerance widened
    # for bf16 MXU matmuls with f32 accumulation).
    ref = reference_nchw(x_nchw, w1_t, bn1, w2_t, bn2, w3_t, bn3)
    ref = jax.block_until_ready(ref)
    assert out_nchw.shape == (N, Cout, H, W)
    assert jnp.allclose(out_nchw, ref, atol=3e-2, rtol=3e-2), (
        float(jnp.max(jnp.abs(out_nchw - ref))))

    print("KERNEL_OK")
</pallas_src>

<mosaic_0001>
module attributes {stable_mosaic.version = 11 : i64} {
  func.func @bottleneck_kernel(%arg0: i32, %arg1: i32, %arg2: memref<1x8x16x16xf32, #tpu.memory_space<vmem>>, %arg3: memref<1x1x16x16xf32, #tpu.memory_space<vmem>>, %arg4: memref<1x1x16x16xf32, #tpu.memory_space<vmem>>, %arg5: memref<16x4xbf16, #tpu.memory_space<vmem>>, %arg6: memref<1x4xf32, #tpu.memory_space<vmem>>, %arg7: memref<1x4xf32, #tpu.memory_space<vmem>>, %arg8: memref<36x4xbf16, #tpu.memory_space<vmem>>, %arg9: memref<1x4xf32, #tpu.memory_space<vmem>>, %arg10: memref<1x4xf32, #tpu.memory_space<vmem>>, %arg11: memref<4x16xbf16, #tpu.memory_space<vmem>>, %arg12: memref<1x16xf32, #tpu.memory_space<vmem>>, %arg13: memref<1x16xf32, #tpu.memory_space<vmem>>, %arg14: memref<1x8x16x16xf32, #tpu.memory_space<vmem>>) attributes {dimension_semantics = [#tpu.dimension_semantics<parallel>, #tpu.dimension_semantics<parallel>], iteration_bounds = array<i64: 2, 2>, scalar_prefetch = 0 : i64, scratch_operands = 0 : i64, tpu.core_type = #tpu.core_type<tc>, window_params = [{transform_indices = @transform_0, window_bounds = array<i64: 1, 8, 16, 16>}, {transform_indices = @transform_1, window_bounds = array<i64: 1, 1, 16, 16>}, {transform_indices = @transform_2, window_bounds = array<i64: 1, 1, 16, 16>}, {pipeline_mode = #tpu.pipeline_mode<synchronous>, transform_indices = @transform_3, window_bounds = array<i64: 16, 4>}, {pipeline_mode = #tpu.pipeline_mode<synchronous>, transform_indices = @transform_4, window_bounds = array<i64: 1, 4>}, {pipeline_mode = #tpu.pipeline_mode<synchronous>, transform_indices = @transform_5, window_bounds = array<i64: 1, 4>}, {pipeline_mode = #tpu.pipeline_mode<synchronous>, transform_indices = @transform_6, window_bounds = array<i64: 36, 4>}, {pipeline_mode = #tpu.pipeline_mode<synchronous>, transform_indices = @transform_7, window_bounds = array<i64: 1, 4>}, {pipeline_mode = #tpu.pipeline_mode<synchronous>, transform_indices = @transform_8, window_bounds = array<i64: 1, 4>}, {pipeline_mode = #tpu.pipeline_mode<synchronous>, transform_indices = @transform_9, window_bounds = array<i64: 4, 16>}, {pipeline_mode = #tpu.pipeline_mode<synchronous>, transform_indices = @transform_10, window_bounds = array<i64: 1, 16>}, {pipeline_mode = #tpu.pipeline_mode<synchronous>, transform_indices = @transform_11, window_bounds = array<i64: 1, 16>}, {transform_indices = @transform_12, window_bounds = array<i64: 1, 8, 16, 16>}]} {
    %c0 = arith.constant 0 : index
    %c0_0 = arith.constant 0 : index
    %c0_1 = arith.constant 0 : index
    %c0_2 = arith.constant 0 : index
    %0 = vector.load %arg2[%c0, %c0_0, %c0_1, %c0_2] : memref<1x8x16x16xf32, #tpu.memory_space<vmem>>, vector<1x8x16x16xf32>
    %1 = vector.shape_cast %0 : vector<1x8x16x16xf32> to vector<8x16x16xf32>
    %c0_3 = arith.constant 0 : index
    %c0_4 = arith.constant 0 : index
    %c0_5 = arith.constant 0 : index
    %c0_6 = arith.constant 0 : index
    %2 = vector.load %arg3[%c0_3, %c0_4, %c0_5, %c0_6] : memref<1x1x16x16xf32, #tpu.memory_space<vmem>>, vector<1x1x16x16xf32>
    %3 = vector.shape_cast %2 : vector<1x1x16x16xf32> to vector<1x16x16xf32>
    %c0_7 = arith.constant 0 : index
    %c0_8 = arith.constant 0 : index
    %c0_9 = arith.constant 0 : index
    %c0_10 = arith.constant 0 : index
    %4 = vector.load %arg4[%c0_7, %c0_8, %c0_9, %c0_10] : memref<1x1x16x16xf32, #tpu.memory_space<vmem>>, vector<1x1x16x16xf32>
    %5 = vector.shape_cast %4 : vector<1x1x16x16xf32> to vector<1x16x16xf32>
    %6 = tpu.concatenate %3, %1, %5 in 0 : vector<1x16x16xf32>, vector<8x16x16xf32>, vector<1x16x16xf32> -> vector<10x16x16xf32>
    %7 = vector.shape_cast %6 : vector<10x16x16xf32> to vector<160x16xf32>
    %8 = arith.truncf %7 : vector<160x16xf32> to vector<160x16xbf16>
    %c0_11 = arith.constant 0 : index
    %c0_12 = arith.constant 0 : index
    %9 = vector.load %arg5[%c0_11, %c0_12] : memref<16x4xbf16, #tpu.memory_space<vmem>>, vector<16x4xbf16>
    %cst = arith.constant dense<0.000000e+00> : vector<160x4xf32>
    %10 = tpu.matmul %8, %9, %cst {dimension_numbers = #tpu.dot_dimension_numbers<[1], [0], [0], [1], [0, 0, 1, 1], [], []>} : vector<160x16xbf16>, vector<16x4xbf16>, vector<160x4xf32> -> vector<160x4xf32>
    %c0_13 = arith.constant 0 : index
    %c0_14 = arith.constant 0 : index
    %11 = vector.load %arg6[%c0_13, %c0_14] : memref<1x4xf32, #tpu.memory_space<vmem>>, vector<1x4xf32>
    %12 = vector.broadcast %11 : vector<1x4xf32> to vector<160x4xf32>
    %13 = arith.mulf %10, %12 : vector<160x4xf32>
    %c0_15 = arith.constant 0 : index
    %c0_16 = arith.constant 0 : index
    %14 = vector.load %arg7[%c0_15, %c0_16] : memref<1x4xf32, #tpu.memory_space<vmem>>, vector<1x4xf32>
    %15 = vector.broadcast %14 : vector<1x4xf32> to vector<160x4xf32>
    %16 = arith.addf %13, %15 : vector<160x4xf32>
    %cst_17 = arith.constant 0.000000e+00 : f32
    %17 = vector.broadcast %cst_17 : f32 to vector<160x4xf32>
    %18 = arith.maximumf %16, %17 : vector<160x4xf32>
    %19 = vector.shape_cast %18 : vector<160x4xf32> to vector<10x16x4xf32>
    %20 = tpu.iota {dimensions = array<i32: 0>} : vector<10x1x1xi32>
    %c0_i32 = arith.constant 0 : i32
    %21 = vector.broadcast %c0_i32 : i32 to vector<10x1x1xi32>
    %22 = arith.cmpi eq, %20, %21 : vector<10x1x1xi32>
    %c0_i32_18 = arith.constant 0 : i32
    %23 = arith.cmpi eq, %arg1, %c0_i32_18 : i32
    %24 = vector.broadcast %23 : i1 to vector<10x1x1xi1>
    %25 = arith.andi %22, %24 : vector<10x1x1xi1>
    %cst_19 = arith.constant 0.000000e+00 : f32
    %26 = vector.shape_cast %25 : vector<10x1x1xi1> to vector<10x1x1xi1>
    %27 = vector.broadcast %26 : vector<10x1x1xi1> to vector<10x16x4xi1>
    %28 = vector.broadcast %cst_19 : f32 to vector<10x16x4xf32>
    %29 = arith.select %27, %28, %19 : vector<10x16x4xi1>, vector<10x16x4xf32>
    %c9_i32 = arith.constant 9 : i32
    %30 = vector.broadcast %c9_i32 : i32 to vector<10x1x1xi32>
    %31 = arith.cmpi eq, %20, %30 : vector<10x1x1xi32>
    %c1_i32 = arith.constant 1 : i32
    %32 = arith.cmpi eq, %arg1, %c1_i32 : i32
    %33 = vector.broadcast %32 : i1 to vector<10x1x1xi1>
    %34 = arith.andi %31, %33 : vector<10x1x1xi1>
    %cst_20 = arith.constant 0.000000e+00 : f32
    %35 = vector.shape_cast %34 : vector<10x1x1xi1> to vector<10x1x1xi1>
    %36 = vector.broadcast %35 : vector<10x1x1xi1> to vector<10x16x4xi1>
    %37 = vector.broadcast %cst_20 : f32 to vector<10x16x4xf32>
    %38 = arith.select %36, %37, %29 : vector<10x16x4xi1>, vector<10x16x4xf32>
    %c1_i32_21 = arith.constant 1 : i32
    %39 = tpu.dynamic_rotate %38 by %c1_i32_21 dim 1 : vector<10x16x4xf32>, i32 -> vector<10x16x4xf32>
    %c15_i32 = arith.constant 15 : i32
    %40 = tpu.dynamic_rotate %38 by %c15_i32 dim 1 : vector<10x16x4xf32>, i32 -> vector<10x16x4xf32>
    %41 = tpu.iota {dimensions = array<i32: 1>} : vector<1x16x1xi32>
    %c0_i32_22 = arith.constant 0 : i32
    %42 = vector.broadcast %c0_i32_22 : i32 to vector<1x16x1xi32>
    %43 = arith.cmpi eq, %41, %42 : vector<1x16x1xi32>
    %cst_23 = arith.constant 0.000000e+00 : f32
    %44 = vector.shape_cast %43 : vector<1x16x1xi1> to vector<1x16x1xi1>
    %45 = vector.broadcast %44 : vector<1x16x1xi1> to vector<10x16x4xi1>
    %46 = vector.broadcast %cst_23 : f32 to vector<10x16x4xf32>
    %47 = arith.select %45, %46, %39 : vector<10x16x4xi1>, vector<10x16x4xf32>
    %c15_i32_24 = arith.constant 15 : i32
    %48 = vector.broadcast %c15_i32_24 : i32 to vector<1x16x1xi32>
    %49 = arith.cmpi eq, %41, %48 : vector<1x16x1xi32>
    %cst_25 = arith.constant 0.000000e+00 : f32
    %50 = vector.shape_cast %49 : vector<1x16x1xi1> to vector<1x16x1xi1>
    %51 = vector.broadcast %50 : vector<1x16x1xi1> to vector<10x16x4xi1>
    %52 = vector.broadcast %cst_25 : f32 to vector<10x16x4xf32>
    %53 = arith.select %51, %52, %40 : vector<10x16x4xi1>, vector<10x16x4xf32>
    %54 = arith.truncf %47 : vector<10x16x4xf32> to vector<10x16x4xbf16>
    %55 = arith.truncf %38 : vector<10x16x4xf32> to vector<10x16x4xbf16>
    %56 = arith.truncf %53 : vector<10x16x4xf32> to vector<10x16x4xbf16>
    %57 = tpu.concatenate %54, %55, %56 in 2 : vector<10x16x4xbf16>, vector<10x16x4xbf16>, vector<10x16x4xbf16> -> vector<10x16x12xbf16>
    %58 = vector.extract_strided_slice %57 {offsets = [0, 0, 0], sizes = [8, 16, 12], strides = [1, 1, 1]} : vector<10x16x12xbf16> to vector<8x16x12xbf16>
    %59 = vector.extract_strided_slice %57 {offsets = [1, 0, 0], sizes = [8, 16, 12], strides = [1, 1, 1]} : vector<10x16x12xbf16> to vector<8x16x12xbf16>
    %60 = vector.extract_strided_slice %57 {offsets = [2, 0, 0], sizes = [8, 16, 12], strides = [1, 1, 1]} : vector<10x16x12xbf16> to vector<8x16x12xbf16>
    %61 = tpu.concatenate %58, %59, %60 in 2 : vector<8x16x12xbf16>, vector<8x16x12xbf16>, vector<8x16x12xbf16> -> vector<8x16x36xbf16>
    %62 = vector.shape_cast %61 : vector<8x16x36xbf16> to vector<128x36xbf16>
    %c0_26 = arith.constant 0 : index
    %c0_27 = arith.constant 0 : index
    %63 = vector.load %arg8[%c0_26, %c0_27] : memref<36x4xbf16, #tpu.memory_space<vmem>>, vector<36x4xbf16>
    %cst_28 = arith.constant dense<0.000000e+00> : vector<128x4xf32>
    %64 = tpu.matmul %62, %63, %cst_28 {dimension_numbers = #tpu.dot_dimension_numbers<[1], [0], [0], [1], [0, 0, 1, 1], [], []>} : vector<128x36xbf16>, vector<36x4xbf16>, vector<128x4xf32> -> vector<128x4xf32>
    %c0_29 = arith.constant 0 : index
    %c0_30 = arith.constant 0 : index
    %65 = vector.load %arg9[%c0_29, %c0_30] : memref<1x4xf32, #tpu.memory_space<vmem>>, vector<1x4xf32>
    %66 = vector.broadcast %65 : vector<1x4xf32> to vector<128x4xf32>
    %67 = arith.mulf %64, %66 : vector<128x4xf32>
    %c0_31 = arith.constant 0 : index
    %c0_32 = arith.constant 0 : index
    %68 = vector.load %arg10[%c0_31, %c0_32] : memref<1x4xf32, #tpu.memory_space<vmem>>, vector<1x4xf32>
    %69 = vector.broadcast %68 : vector<1x4xf32> to vector<128x4xf32>
    %70 = arith.addf %67, %69 : vector<128x4xf32>
    %cst_33 = arith.constant 0.000000e+00 : f32
    %71 = vector.broadcast %cst_33 : f32 to vector<128x4xf32>
    %72 = arith.maximumf %70, %71 : vector<128x4xf32>
    %73 = arith.truncf %72 : vector<128x4xf32> to vector<128x4xbf16>
    %c0_34 = arith.constant 0 : index
    %c0_35 = arith.constant 0 : index
    %74 = vector.load %arg11[%c0_34, %c0_35] : memref<4x16xbf16, #tpu.memory_space<vmem>>, vector<4x16xbf16>
    %cst_36 = arith.constant dense<0.000000e+00> : vector<128x16xf32>
    %75 = tpu.matmul %73, %74, %cst_36 {dimension_numbers = #tpu.dot_dimension_numbers<[1], [0], [0], [1], [0, 0, 1, 1], [], []>} : vector<128x4xbf16>, vector<4x16xbf16>, vector<128x16xf32> -> vector<128x16xf32>
    %c0_37 = arith.constant 0 : index
    %c0_38 = arith.constant 0 : index
    %76 = vector.load %arg12[%c0_37, %c0_38] : memref<1x16xf32, #tpu.memory_space<vmem>>, vector<1x16xf32>
    %77 = vector.broadcast %76 : vector<1x16xf32> to vector<128x16xf32>
    %78 = arith.mulf %75, %77 : vector<128x16xf32>
    %c0_39 = arith.constant 0 : index
    %c0_40 = arith.constant 0 : index
    %79 = vector.load %arg13[%c0_39, %c0_40] : memref<1x16xf32, #tpu.memory_space<vmem>>, vector<1x16xf32>
    %80 = vector.broadcast %79 : vector<1x16xf32> to vector<128x16xf32>
    %81 = arith.addf %78, %80 : vector<128x16xf32>
    %82 = vector.shape_cast %81 : vector<128x16xf32> to vector<8x16x16xf32>
    %83 = arith.addf %82, %1 : vector<8x16x16xf32>
    %cst_41 = arith.constant 0.000000e+00 : f32
    %84 = vector.broadcast %cst_41 : f32 to vector<8x16x16xf32>
    %85 = arith.maximumf %83, %84 : vector<8x16x16xf32>
    %c0_42 = arith.constant 0 : index
    %c0_43 = arith.constant 0 : index
    %c0_44 = arith.constant 0 : index
    %c0_45 = arith.constant 0 : index
    %86 = vector.load %arg14[%c0_42, %c0_43, %c0_44, %c0_45] : memref<1x8x16x16xf32, #tpu.memory_space<vmem>>, vector<1x8x16x16xf32>
    %87 = vector.shape_cast %86 : vector<1x8x16x16xf32> to vector<8x16x16xf32>
    %88 = vector.shape_cast %85 : vector<8x16x16xf32> to vector<1x8x16x16xf32>
    tpu.vector_store %arg14[%c0_42, %c0_43, %c0_44, %c0_45], %88 {strides = array<i32>} : memref<1x8x16x16xf32, #tpu.memory_space<vmem>>, vector<1x8x16x16xf32>,
    return
  }
  func.func @transform_0(%arg0: i32, %arg1: i32) -> (i32, i32, i32, i32) {
    %c0_i32 = arith.constant 0 : i32
    %c0_i32_0 = arith.constant 0 : i32
    %c0_i32_1 = arith.constant 0 : i32
    return %arg0, %arg1, %c0_i32, %c0_i32_0 : i32, i32, i32, i32
  }
  func.func @transform_1(%arg0: i32, %arg1: i32) -> (i32, i32, i32, i32) {
    %c8_i32 = arith.constant 8 : i32
    %0 = arith.muli %arg1, %c8_i32 : i32
    %c1_i32 = arith.constant 1 : i32
    %1 = arith.subi %0, %c1_i32 : i32
    %c0_i32 = arith.constant 0 : i32
    %2 = arith.maxsi %1, %c0_i32 : i32
    %c0_i32_0 = arith.constant 0 : i32
    %c0_i32_1 = arith.constant 0 : i32
    %c0_i32_2 = arith.constant 0 : i32
    return %arg0, %2, %c0_i32_0, %c0_i32_1 : i32, i32, i32, i32
  }
  func.func @transform_2(%arg0: i32, %arg1: i32) -> (i32, i32, i32, i32) {
    %c8_i32 = arith.constant 8 : i32
    %0 = arith.muli %arg1, %c8_i32 : i32
    %c8_i32_0 = arith.constant 8 : i32
    %1 = arith.addi %0, %c8_i32_0 : i32
    %c15_i32 = arith.constant 15 : i32
    %2 = arith.minsi %1, %c15_i32 : i32
    %c0_i32 = arith.constant 0 : i32
    %c0_i32_1 = arith.constant 0 : i32
    %c0_i32_2 = arith.constant 0 : i32
    return %arg0, %2, %c0_i32, %c0_i32_1 : i32, i32, i32, i32
  }
  func.func @transform_3(%arg0: i32, %arg1: i32) -> (i32, i32) {
    %c0_i32 = arith.constant 0 : i32
    %c0_i32_0 = arith.constant 0 : i32
    %c0_i32_1 = arith.constant 0 : i32
    return %c0_i32, %c0_i32_0 : i32, i32
  }
  func.func @transform_4(%arg0: i32, %arg1: i32) -> (i32, i32) {
    %c0_i32 = arith.constant 0 : i32
    %c0_i32_0 = arith.constant 0 : i32
    %c0_i32_1 = arith.constant 0 : i32
    return %c0_i32, %c0_i32_0 : i32, i32
  }
  func.func @transform_5(%arg0: i32, %arg1: i32) -> (i32, i32) {
    %c0_i32 = arith.constant 0 : i32
    %c0_i32_0 = arith.constant 0 : i32
    %c0_i32_1 = arith.constant 0 : i32
    return %c0_i32, %c0_i32_0 : i32, i32
  }
  func.func @transform_6(%arg0: i32, %arg1: i32) -> (i32, i32) {
    %c0_i32 = arith.constant 0 : i32
    %c0_i32_0 = arith.constant 0 : i32
    %c0_i32_1 = arith.constant 0 : i32
    return %c0_i32, %c0_i32_0 : i32, i32
  }
  func.func @transform_7(%arg0: i32, %arg1: i32) -> (i32, i32) {
    %c0_i32 = arith.constant 0 : i32
    %c0_i32_0 = arith.constant 0 : i32
    %c0_i32_1 = arith.constant 0 : i32
    return %c0_i32, %c0_i32_0 : i32, i32
  }
  func.func @transform_8(%arg0: i32, %arg1: i32) -> (i32, i32) {
    %c0_i32 = arith.constant 0 : i32
    %c0_i32_0 = arith.constant 0 : i32
    %c0_i32_1 = arith.constant 0 : i32
    return %c0_i32, %c0_i32_0 : i32, i32
  }
  func.func @transform_9(%arg0: i32, %arg1: i32) -> (i32, i32) {
    %c0_i32 = arith.constant 0 : i32
    %c0_i32_0 = arith.constant 0 : i32
    %c0_i32_1 = arith.constant 0 : i32
    return %c0_i32, %c0_i32_0 : i32, i32
  }
  func.func @transform_10(%arg0: i32, %arg1: i32) -> (i32, i32) {
    %c0_i32 = arith.constant 0 : i32
    %c0_i32_0 = arith.constant 0 : i32
    %c0_i32_1 = arith.constant 0 : i32
    return %c0_i32, %c0_i32_0 : i32, i32
  }
  func.func @transform_11(%arg0: i32, %arg1: i32) -> (i32, i32) {
    %c0_i32 = arith.constant 0 : i32
    %c0_i32_0 = arith.constant 0 : i32
    %c0_i32_1 = arith.constant 0 : i32
    return %c0_i32, %c0_i32_0 : i32, i32
  }
  func.func @transform_12(%arg0: i32, %arg1: i32) -> (i32, i32, i32, i32) {
    %c0_i32 = arith.constant 0 : i32
    %c0_i32_0 = arith.constant 0 : i32
    %c0_i32_1 = arith.constant 0 : i32
    return %arg0, %arg1, %c0_i32, %c0_i32_0 : i32, i32, i32, i32
  }
}

</mosaic_0001>

<bundles_post_ra>
// kernel: tpu_custom_call.1
= control target key start
LH: loop header
LB: loop body
LE: loop exit
PB: predicated region body
PF: predicated region fallthrough
CT: control target
= control target key end

     0   :  { %s3349_s0 = inlined_call_operand.hbm [shape: f32[2,16,16,16], index: 0, kind: input, shape index: {}]   ;;  %s3350_s1 = inlined_call_operand.hbm [shape: f32[2,16,16,16], index: 1, kind: input, shape index: {}]   ;;  %s3351_s2 = inlined_call_operand.hbm [shape: f32[2,16,16,16], index: 2, kind: input, shape index: {}]   ;;  %s3352_s3 = inlined_call_operand.vmem [shape: bf16[16,4], index: 3, kind: input, shape index: {}]   ;;  %s3353_s4 = inlined_call_operand.vmem [shape: f32[1,4], index: 4, kind: input, shape index: {}]   ;;  %s3354_s5 = inlined_call_operand.vmem [shape: f32[1,4], index: 5, kind: input, shape index: {}]   ;;  %s3355_s6 = inlined_call_operand.vmem [shape: bf16[36,4], index: 6, kind: input, shape index: {}]   ;;  %s3356_s7 = inlined_call_operand.vmem [shape: f32[1,4], index: 7, kind: input, shape index: {}]   ;;  %s3357_s8 = inlined_call_operand.vmem [shape: f32[1,4], index: 8, kind: input, shape index: {}]   ;;  %s3358_s9 = inlined_call_operand.vmem [shape: bf16[4,16], index: 9, kind: input, shape index: {}]   ;;  %s3359_s10 = inlined_call_operand.vmem [shape: f32[1,16], index: 10, kind: input, shape index: {}]   ;;  %s3360_s11 = inlined_call_operand.vmem [shape: f32[1,16], index: 11, kind: input, shape index: {}]   ;;  %s3361_s12 = inlined_call_operand.hbm [shape: f32[2,16,16,16], index: 12, kind: output, shape index: {}]  }
   0x1   :  { %3380 = sst [smem:[#allocation26_spill]] %s3349_s0 }
   0x2   :  { %3381 = sst [smem:[#allocation27_spill]] %s3350_s1 }
   0x3   :  { %3382 = sst [smem:[#allocation28_spill]] %s3352_s3 }
   0x4   :  { %3383 = sst [smem:[#allocation29_spill]] %s3353_s4 }
   0x5   :  { %3384 = sst [smem:[#allocation30_spill]] %s3354_s5 }
   0x6   :  { %3385 = sst [smem:[#allocation31_spill]] %s3355_s6 }
   0x7   :  { %3386 = sst [smem:[#allocation32_spill]] %s3356_s7 }
   0x8   :  { %3387 = sst [smem:[#allocation33_spill]] %s3357_s8 }
   0x9   :  { %3388 = sst [smem:[#allocation34_spill]] %s3358_s9 }
   0xa   :  { %3389 = sst [smem:[#allocation35_spill]] %s3359_s10 }
   0xb   :  { %3390 = sst [smem:[#allocation36_spill]] %s3360_s11 }
   0xc   :  { %3391 = sst [smem:[#allocation37_spill]] %s3361_s12 }
   0xd   :  { %17 = vsyncpa [#allocation3], 0 }
   0xe   :  { %19 = vsyncpa [#allocation3 + $0x1], 0 }
   0xf   :  { %20 = vsyncpa [#allocation6], 0 }
  0x10   :  { %22 = vsyncpa [#allocation6 + $0x1], 0 }
  0x11   :  { %23 = vsyncpa [#allocation4], 0 }
  0x12   :  { %25 = vsyncpa [#allocation4 + $0x1], 0  ;;  %s2385_s21 = smov 0   ;;  %s2387_s22 = smov 0  }
  0x13   :  { %s2389_s23 = smov 0   ;;  %s2391_s24 = smov 0  }
  0x14   :  { %s2393_s25 = smov 0   ;;  %s2395_s26 = smov 0  }
  0x15   :  { %s2397_s27 = smov 0   ;;  %s2399_s28 = smov 0  }
  0x16   :  { %s2401_s29 = smov 0   ;;  %s2403_s30 = smov 0  }
  0x17   :  { %s2405_s13 = smov 0   ;;  %s2407_s14 = smov 0  }
  0x18   :  { %s2409_s15 = smov 0   ;;  %s2411_s16 = smov 0  }
  0x19 LB: > { %3392 = sst [smem:[#allocation13_spill]] %s2279_s26  ;;  %s2456_s17 = sadd.s32 4294967295, %s2311_s16   ;;  %s2311_s16 = sphi %s2411_s16, %s31_s16   ;;  %s2307_s15 = sphi %s2409_s15, %s3454_s15   ;;  %s2303_s14 = sphi %s2407_s14, %s3443_s14   ;;  %s2299_s13 = sphi %s2405_s13, %s3442_s13   ;;  %s2295_s30 = sphi %s2403_s30, %s3453_s30   ;;  %s2291_s29 = sphi %s2401_s29, %s3440_s29   ;;  %s2287_s28 = sphi %s2399_s28, %s3452_s28   ;;  %s2283_s27 = sphi %s2397_s27, %s3451_s27   ;;  %s2279_s26 = sphi %s2395_s26, %s3438_s26   ;;  %s2275_s25 = sphi %s2393_s25, %s3450_s25   ;;  %s2271_s24 = sphi %s2391_s24, %s3449_s24   ;;  %s2267_s23 = sphi %s2389_s23, %s3448_s23   ;;  %s2263_s22 = sphi %s2387_s22, %s3447_s22   ;;  %s2259_s21 = sphi %s2385_s21, %s3446_s21  }
  0x1a   : > { %3393 = sst [smem:[#allocation14_spill]] %s2283_s27  ;;  %s40_s18 = sadd.s32 1, %s2303_s14 }
  0x1b   : > { %3394 = sst [smem:[#allocation15_spill]] %s2291_s29  ;;  %p41_p0 = scmp.ge.s32.totalorder %s40_s18, 2 }
  0x1c   : > { %3395 = sst [smem:[#allocation16_spill]] %s2295_s30  ;;  %s43_s19 = sadd.s32 1, %s2307_s15 }
  0x1d   : > { %3396 = sst [smem:[#allocation17_spill]] %s2299_s13  ;;  %p60_p1 = scmp.eq.s32.totalorder %s2311_s16, 0 }
  0x1e   : > { %3397 = sst [smem:[#allocation18_spill]] %s2303_s14  ;;  %p66_p2 = scmp.eq.s32.totalorder %s2456_s17, 0 }
  0x1f   : > { %3398 = sst [smem:[#allocation19_spill]] %s2307_s15  ;;  %s3456_s18 = smov (%p41_p0, %s40_s18), 0 }
  0x20   : > { %3399 = sst [smem:[#allocation20_spill]] %s3456_s18  ;;  %s3458_s19 = smov (!%p41_p0, %s43_s19), %s2307_s15 }
  0x21   : > { %s48_s20 = ssub.s32 %s2303_s14, %s3456_s18  ;;  %s1818_s12 = sshll.u32 %s2303_s14, 3 }
  0x22   : > { %p45_p3 = scmp.ge.s32.totalorder %s3458_s19, 2  ;;  %s1819_s13 = sadd.s32 4294967295, %s1818_s12 }
  0x23   : > { %p77_p4 = scmp.gt.s32.totalorder %s1819_s13, 0  ;;  %s1820_s11 = sshll.u32 %s3456_s18, 3 }
  0x24   : > { %s3460_s19 = smov (%p45_p3, %s3458_s19), 0  ;;  %s1821_s8 = sadd.s32 4294967295, %s1820_s11 }
  0x25   : > { %3400 = sst [smem:[#allocation21_spill]] %s3460_s19  ;;  %s3462_s13 = smov (!%p77_p4, %s1819_s13), 0 }
  0x26   : > { %s2473_s10 = ssub.s32 %s2307_s15, %s3460_s19  ;;  %p81_p5 = scmp.gt.s32.totalorder %s1821_s8, 0 }
  0x27   : > { %s2476_s7 = sor.u32 %s48_s20, %s2473_s10  ;;  %s88_s9 = sadd.s32 1, %s2279_s26 }
  0x28   : > { %p50_p6 = scmp.eq.s32.totalorder %s2476_s7, 0  ;;  %s3464_s8 = smov (!%p81_p5, %s1821_s8), 0 }
  0x29   : > { %p95_p7 = scmp.ne.s32.totalorder %s2279_s26, %s2275_s25  ;;  %p101_p8 = scmp.ne.s32.totalorder %s2275_s25, %s2271_s24 }
  0x2a   : > { %s84_s18 = ssub.s32 %s3462_s13, %s3464_s8  ;;  %s2484_s19 = sadd.s32 8, %s1818_s12 }
  0x2b   : > { %s85_s6 = sor.u32 %s84_s18, %s2473_s10  ;;  %p2489_p9 = por %p95_p7, %p60_p1 }
  0x2c   : > { %p86_p10 = scmp.eq.s32.totalorder %s85_s6, 0  ;;  %p2495_p11 = por %p101_p8, %p66_p2 }
  0x2d   : > { %s2500_s24 = sadd.s32 8, %s1820_s11  ;;  %p3378_p0 = scmp.lt.s32.totalorder %s2311_s16, 4 }
  0x2e   : > { %s3402_s5 = scalar_select %p2495_p11, 1, 0 }
  0x2f   : > { %s2503_s8 = scalar_select %p86_p10, %s2279_s26, %s88_s9  }
  0x30   : > { %3403 = sst [smem:[#allocation22_spill]] %s3402_s5  ;;  %s2508_s12 = sshll.u32 %s2307_s15, 5 }
  0x31   : > { %3404 = sst [smem:[#allocation23_spill]] %s2503_s8  ;;  %s430_s6 = sand.u32 1, %s2311_s16  }
  0x32   : > { %s432_s18 = sand.u32 1, %s2279_s26   ;;  %s1834_s30 = sshll.u32 %s3462_s13, 1 }
  0x33   : > { %s1831_s4 = sshll.u32 %s432_s18, 4  ;;  %s443_s3 = sadd.s32 %s1834_s30, %s2508_s12 }
  0x34   : > { %s434_s5 = scalar_lea.vmem [#allocation5], %s1831_s4  ;;  %s1836_s9 = sshll.u32 %s443_s3, 3 }
  0x35   : > { %s448_s11 = sshll.u32 %s434_s5, 4  ;;  %s3405_s1 = sld [smem:[#allocation27_spill]]  ;;  %s449_s11 = int_to_ptr.vmem [resolvable:$true] %s448_s11 }
  0x36   : > { %p1914_p3 = pnand %p3378_p0, %p2489_p9  ;;  %p1842_p4 = scmp.ge.s32.totalorder %s2311_s16, 1 }
  0x37   : > { %s2521_s4 = scalar_lea.sflag [#allocation6], %s430_s6  ;;  %s3371_s3 = smov 128  }
  0x38   : > { %s3373_s5 = smov 8   ;;  %p484_p5 = scmp.lt.s32.totalorder %s2311_s16, 5 }
  0x39   : > { %s52_s15 = sadd.s32 1, %s2291_s29  ;;  %p59_p8 = scmp.ne.s32.totalorder %s2291_s29, %s2287_s28 }
  0x3a   : > { %p2528_p7 = pnand %p1842_p4, %p484_p5  ;;  %p65_p9 = scmp.ne.s32.totalorder %s2287_s28, %s2283_s27 }
  0x3b   : > { %s445_s26 = scalar_lea.hbm %s3405_s1, %s1836_s9  ;;  %p352_p10 = scmp.eq.s32.totalorder %s2456_s17, 3 }
  0x3c   : > { %s446_s30 = sshll.u32 %s445_s26, 4  ;;  %s1817_s26 = sadd.s32 4294967294, %s2311_s16   ;;  %s447_s30 = int_to_ptr.hbm [resolvable:$true] %s446_s30 }
  0x3d   : > { %1916 = dma.hbm_to_vmem [thread:$0]  (!%p1914_p3), %s447_s30, 256, %s449_s11, %s2521_s4, %s3371_s3, %s3371_s3, %s3373_s5  }
  0x3e   : > { %s2537_s20 = scalar_select %p50_p6, %s2291_s29, %s52_s15  }
  0x3f   : > { %p358_p13 = scmp.eq.s32.totalorder %s1817_s26, 3  ;;  %p2546_p12 = por %p60_p1, %p59_p8 }
  0x40   : > { %3407 = sst [smem:[#allocation24_spill]] %s2537_s20  ;;  %p2552_p3 = por %p66_p2, %p65_p9 }
  0x41   : > { %p2556_p4 = por %p352_p10, %p59_p8  ;;  %p2560_p6 = por %p358_p13, %p65_p9 }
  0x42   : > { %s405_s11 = sand.u32 1, %s2291_s29   ;;  %s1892_s9 = sshll.u32 %s2303_s14, 4 }
  0x43   : > { %s3411_s18 = scalar_select %p2560_p6, 1, 0 }
  0x44   : > { %s1826_s30 = sshll.u32 %s405_s11, 7  ;;  %s415_s26 = sadd.s32 %s1892_s9, %s2508_s12 }
  0x45   : > { %3412 = sst [smem:[#allocation25_spill]] %s3411_s18  ;;  %s1830_s15 = sshll.u32 %s415_s26, 3 }
  0x46   : > { %s409_s3 = scalar_lea.vmem [#allocation2], %s1826_s30  ;;  %s3413_s0 = sld [smem:[#allocation26_spill]] }
  0x47   : > { %s420_s5 = sshll.u32 %s409_s3, 4  ;;  %p1911_p13 = pnand %p3378_p0, %p2546_p12  ;;  %s421_s5 = int_to_ptr.vmem [resolvable:$true] %s420_s5 }
  0x48   : > { %s406_s9 = scalar_lea.sflag [#allocation3], %s405_s11  ;;  %s3414_s14 = smov 8  }
  0x49   : > { %s3415_s26 = smov 128   ;;  %p3416_p5 = scmp.lt.s32.totalorder %s2484_s19, 15 }
  0x4a   : > { %p3417_p8 = scmp.lt.s32.totalorder %s2500_s24, 15  ;;  %s124_s1 = sadd.s32 1, %s2267_s23 }
  0x4b   : > { %s3466_s19 = smov (!%p3416_p5, %s2484_s19), 15  ;;  %p131_p9 = scmp.ne.s32.totalorder %s2267_s23, %s2263_s22 }
  0x4c   : > { %s417_s18 = scalar_lea.hbm %s3413_s0, %s1830_s15  ;;  %s3468_s24 = smov (!%p3417_p8, %s2500_s24), 15 }
  0x4d   : > { %s418_s29 = sshll.u32 %s417_s18, 4  ;;  %s120_s3 = ssub.s32 %s3466_s19, %s3468_s24  ;;  %s419_s29 = int_to_ptr.hbm [resolvable:$true] %s418_s29 }
  0x4e   : > { %1913 = dma.hbm_to_vmem [thread:$0]  (!%p1911_p13), %s419_s29, 2048, %s421_s5, %s406_s9, %s3415_s26, %s3415_s26, %s3414_s14  }
  0x4f   : > { %p137_p10 = scmp.ne.s32.totalorder %s2263_s22, %s2259_s21  ;;  %s121_s20 = sor.u32 %s120_s3, %s2473_s10 }
  0x50   : > { %p2591_p12 = por %p131_p9, %p60_p1  ;;  %p122_p0 = scmp.eq.s32.totalorder %s121_s20, 0 }
  0x51   : > { %p2597_p13 = por %p137_p10, %p66_p2  ;;  %s460_s5 = sand.u32 1, %s2267_s23  }
  0x52   : > { %s1839_s18 = sshll.u32 %s3466_s19, 1  ;;  %s1837_s21 = sshll.u32 %s460_s5, 4 }
  0x53   : > { %s2603_s11 = scalar_select %p122_p0, %s2267_s23, %s124_s1  }
  0x54   : > { %s471_s10 = sadd.s32 %s1839_s18, %s2508_s12  ;;  %s462_s3 = scalar_lea.vmem [#allocation7], %s1837_s21 }
  0x55   : > { %s1841_s24 = sshll.u32 %s471_s10, 3  ;;  %s476_s0 = sshll.u32 %s462_s3, 4  ;;  %s477_s0 = int_to_ptr.vmem [resolvable:$true] %s476_s0 }
  0x56   : > { %s473_s9 = scalar_lea.hbm %s3351_s2, %s1841_s24  ;;  %p3420_p1 = scmp.lt.s32.totalorder %s2311_s16, 4 }
  0x57   : > { %s474_s27 = sshll.u32 %s473_s9, 4  ;;  %488 = sbr.rel (%p2528_p7) target bundleno = 1057 (0x421), region = 68  ;;  %s475_s27 = int_to_ptr.hbm [resolvable:$true] %s474_s27 }
  0x58   : > { %p1917_p2 = pnand %p3420_p1, %p2591_p12  ;;  %s2620_s19 = sand.u32 (!%p2528_p7), 1, %s2287_s28  }
  0x59   : > { %s1843_s12 = sshll.u32 (!%p2528_p7), %s2620_s19, 7  ;;  %s491_s1 = scalar_lea.sflag (!%p2528_p7), [#allocation3], %s2620_s19 }
  0x5a   : > { %1919 = dma.hbm_to_vmem [thread:$0]  (!%p1917_p2), %s475_s27, 256, %s477_s0, %s2521_s4, %s3415_s26, %s3415_s26, %s3414_s14  }
  0x5b   : > { %s2626_s20 = scalar_lea.vmem (!%p2528_p7), [#allocation2], %s1843_s12 }
  0x5c   : > { %2242 = dma.done.wait (%p2552_p3), %s491_s1, 2048  }
  0x5d   : > { %2244 = vsyncadd (%p2552_p3), %s491_s1, 4294965248  ;;  %s500_s27 = sand.u32 1, %s2456_s17   ;;  %s502_s14 = sand.u32 1, %s2275_s25  }
  0x5e   : > { %s1844_s4 = sshll.u32 %s502_s14, 4  ;;  %s501_s13 = scalar_lea.sflag [#allocation6], %s500_s27 }
  0x5f   : > { %s504_s26 = scalar_lea.vmem [#allocation5], %s1844_s4 }
  0x60   : > { %2246 = dma.done.wait (%p2495_p11), %s501_s13, 256  }
  0x61   : > { %2248 = vsyncadd (%p2495_p11), %s501_s13, 4294967040  ;;  %s512_s8 = sand.u32 1, %s2263_s22  }
  0x62   : > { %s2639_s5 = sshll.u32 %s512_s8, 4 }
  0x63   : > { %s514_s6 = scalar_lea.vmem [#allocation7], %s2639_s5 }
  0x64   : > { %2250 = dma.done.wait (%p2597_p13), %s501_s13, 256  }
  0x65   : > { %2252 = vsyncadd (%p2597_p13), %s501_s13, 4294967040  ;;  %s3422_s21 = sld [smem:[#allocation28_spill]]  ;;  %v593_v1 = vld [vmem:[%s504_s26] sm:$0xff]  ;;  %v594_v2 = vld [vmem:[%s504_s26 + $0x8] sm:$0xff]  ;;  %vm615_vm0 = vcmask 130048   ;;  %v845_v32 = vlaneseq  ;;  %s2315_s0 = smov 4  }
  0x66   : > { %v597_v3 = vpack.c.bf16 %v594_v2, %v593_v1  ;;  %v577_v4 = vld [vmem:[%s2626_s20] sm:$0xff]  ;;  %v578_v5 = vld [vmem:[%s2626_s20 + $0x8] sm:$0xff]  ;;  %v579_v7 = vld [vmem:[%s2626_s20 + $0x10] sm:$0xff]  ;;  %s3423_s29 = sld [smem:[#allocation16_spill]]  ;;  %s2316_s27 = smov 8   ;;  %vm1212_vm6 = vcmask 31744  }
  0x67   : > { %v598_v6 = vpack.c.bf16 %v578_v5, %v577_v4  ;;  %v580_v8 = vld [vmem:[%s2626_s20 + $0x18] sm:$0xff]  ;;  %v581_v10 = vld [vmem:[%s2626_s20 + $0x20] sm:$0xff]  ;;  %v582_v11 = vld [vmem:[%s2626_s20 + $0x28] sm:$0xff]  ;;  %s3424_s30 = sld [smem:[#allocation29_spill]]  ;;  %v2686_v36 = vshrl.u32 %v845_v32, 7  ;;  %vm1243_vm7 = vcmask 64512  }
  0x68   : > { %v599_v9 = vpack.c.bf16 %v580_v8, %v579_v7  ;;  %v600_v12 = vpack.c.bf16 %v582_v11, %v581_v10  ;;  %v583_v13 = vld [vmem:[%s2626_s20 + $0x30] sm:$0xff]  ;;  %v584_v14 = vld [vmem:[%s2626_s20 + $0x38] sm:$0xff]  ;;  %v585_v16 = vld [vmem:[%s2626_s20 + $0x40] sm:$0xff]  ;;  %s3425_s3 = sld [smem:[#allocation30_spill]]  ;;  %s2317_s14 = smov 12   ;;  %vm1376_vm8 = vcmask 1041408  }
  0x69   : > { %v601_v15 = vpack.c.bf16 %v584_v14, %v583_v13  ;;  %v586_v17 = vld [vmem:[%s2626_s20 + $0x48] sm:$0xff]  ;;  %v587_v19 = vld [vmem:[%s2626_s20 + $0x50] sm:$0xff]  ;;  %v588_v20 = vld [vmem:[%s2626_s20 + $0x58] sm:$0xff]  ;;  %vm847_vm2 = vcmp.lt.s32.totalorder %v2686_v36, 1  ;;  %vm910_vm3 = vcmp.eq.s32.totalorder %v2686_v36, 0  ;;  %v2716_v61 = vadd.s32 8, %v2686_v36 }
  0x6a   : > { %v602_v18 = vpack.c.bf16 %v586_v17, %v585_v16  ;;  %v603_v21 = vpack.c.bf16 %v588_v20, %v587_v19  ;;  %v589_v22 = vld [vmem:[%s2626_s20 + $0x60] sm:$0xff]  ;;  %v590_v23 = vld [vmem:[%s2626_s20 + $0x68] sm:$0xff]  ;;  %v591_v44 = vld [vmem:[%s2626_s20 + $0x70] sm:$0xff]  ;;  %vm888_vm4 = vcmp.lt.s32.totalorder %v2686_v36, 7  ;;  %s2318_s4 = smov 24   ;;  %s3426_s8 = sld [smem:[#allocation31_spill]] }
  0x6b   : > { %v1893_v0 = vld [vmem:[%s3422_s21] sm:$0xff]  ;;  %v604_v24 = vpack.c.bf16 %v590_v23, %v589_v22  ;;  %v592_v45 = vld [vmem:[%s2626_s20 + $0x78] sm:$0xff]  ;;  %vm937_vm5 = vcmp.eq.s32.totalorder %v2716_v61, 15  ;;  %vm1305_vm10 = vcmask 97280   ;;  %vm1322_vm11 = vcmask 195584   ;;  %s3430_s26 = sld [smem:[#allocation35_spill]] }
  0x6c   : > { %653 = vmatpush.bf16.msra.mxu0 %v1893_v0  ;;  %1897 = vmatpush.bf16.msra.mxu3 %v1893_v0  ;;  %p773_p11 = scmp.eq.s32.totalorder %s3423_s29, 0  ;;  %v605_v46 = vpack.c.bf16 %v592_v45, %v591_v44  ;;  %v595_v10 = vld [vmem:[%s514_s6] sm:$0xff]  ;;  %v596_v11 = vld [vmem:[%s514_s6 + $0x8] sm:$0xff]  ;;  %p799_p0 = scmp.eq.s32.totalorder %s3423_s29, 1  ;;  %vm1359_vm12 = vcmask 293888  }
  0x6d   : > { %v2674_v25 = vld [vmem:[%s3424_s30] ss:$0 sm:$0xff]  ;;  %v606_v14 = vpack.c.bf16 %v596_v11, %v595_v10  ;;  %s3427_s30 = sld [smem:[#allocation34_spill]]  ;;  %s3185_s18 = scalar_lea.vmem [#allocation8], %s1843_s12 }
  0x6e   : > { %v2681_v28 = vld [vmem:[%s3425_s3] ss:$0 sm:$0xff]  ;;  %s774_s1 = scalar_select %p773_p11, 1, 0 }
  0x6f   : > { %1851 = vmatmul.msk.bf16.vlgmr.msra.gmra.mxu0 %vm615_vm0, %v597_v3  ;;  %1858 = vmatmul.msk.bf16.vlgmr.msra.gmra.mxu3 %vm615_vm0, %v604_v24  ;;  %s800_s5 = scalar_select %p799_p0, 1, 0 }
  0x70   : > { %v775_v30 = vstv %s774_s1  ;;  %s3428_s3 = sld [smem:[#allocation32_spill]]  ;;  %s1896_s21 = sshll.u32 %s3423_s29, 4 }
  0x71   : > { %vm776_vm1 = vcmp.eq.s32.totalorder %v775_v30, 1  ;;  %s3431_s17 = sld [smem:[#allocation36_spill]]  ;;  %s1674_s1 = sshll.u32 %s3185_s18, 4  ;;  %s1675_s1 = int_to_ptr.vmem [resolvable:$true] %s1674_s1 }
  0x72   : > { %s3432_s12 = sld [smem:[#allocation17_spill]] }
  0x73   : > { %s3433_s9 = sld [smem:[#allocation37_spill]] }
  0x78   : > { %s1888_s10 = sshll.u32 %s3432_s12, 5 }
  0x79   : > { %s1671_s24 = sadd.s32 %s1896_s21, %s1888_s10  ;;  %s2177_s6 = scalar_lea.hbm %s3433_s9, 512 }
  0x7f   : > { %1852 = vmatmul.msk.bf16.gmra.mxu0 %vm615_vm0, %v598_v6  ;;  %1859 = vmatmul.msk.bf16.gmra.mxu3 %vm615_vm0, %v605_v46 }
  0x8f   : > { %1853 = vmatmul.msk.bf16.gmra.mxu0 %vm615_vm0, %v599_v9  ;;  %1860 = vmatmul.msk.bf16.gmra.mxu3 %vm615_vm0, %v606_v14 }
  0x9f   : > { %1854 = vmatmul.msk.bf16.gmra.mxu0 %vm615_vm0, %v600_v12 }
  0xaf   : > { %1855 = vmatmul.msk.bf16.gmra.mxu0 %vm615_vm0, %v601_v15 }
  0xbf   : > { %1856 = vmatmul.msk.bf16.gmra.mxu0 %vm615_vm0, %v602_v18 }
  0xcf   : > { %1857 = vmatmul.msk.bf16.gmra.mxu0 %vm615_vm0, %v603_v21 }
  0xec   : > { %v655_v26 = vpop.f32.mrf.mxu0 }
  0xed   : > { %v709_v27 = vmul.f32 %v2674_v25, %v655_v26 }
  0xef   : > { %v733_v29 = vadd.f32 %v2681_v28, %v709_v27 }
  0xf1   : > { %v753_v34 = vmax.f32 %v733_v29, 0.0 }
  0xf3   : > { %v2688_v38 = vsel %vm776_vm1, 0.0, %v753_v34 }
  0xf4   : > { %v657_v31 = vpop.f32.mrf.mxu0  ;;  %v825_v42 = vrot.slane %v2688_v38, 7 }
  0xf5   : > { %v710_v33 = vmul.f32 %v2674_v25, %v657_v31 }
  0xf7   : > { %v734_v35 = vadd.f32 %v2681_v28, %v710_v33 }
  0xf9   : > { %v754_v37 = vmax.f32 %v734_v35, 0.0 }
  0xfb   : > { %v2690_v39 = vsel %vm776_vm1, 0.0, %v754_v37 }
  0xfc   : > { %v835_v40 = vrot.slane %v2690_v39, 7  ;;  %v660_v41 = vpop.f32.mrf.mxu0 }
  0xfd   : > { %v711_v43 = vmul.f32 %v2674_v25, %v660_v41 }
  0xfe   : > { %v848_v47 = vsel %vm847_vm2, %v825_v42, %v835_v40  ;;  %v858_v49 = vsel %vm847_vm2, %v835_v40, %v825_v42 }
  0xff   : > { %v735_v48 = vadd.f32 %v2681_v28, %v711_v43  ;;  %v963_v50 = vpack.c.bf16 %v848_v47, %v848_v47  ;;  %v916_v51 = vsel %vm910_vm3, 0.0, %v858_v49 }
 0x100   : > { %v962_v52 = vpack.c.bf16 %v916_v51, %v916_v51 }
 0x101   : > { %v2707_v53 = vunpack.c.l.b16 %v963_v50  ;;  %v755_v54 = vmax.f32 %v735_v48, 0.0 }
 0x102   : > { %v2709_v56 = vunpack.c.l.b16 %v962_v52 }
 0x103   : > { %v984_v60 = vpack.c.bf16 %v755_v54, %v755_v54  ;;  %v869_v63 = vrot.slane %v755_v54, 1  ;;  %v826_v3 = vrot.slane %v755_v54, 7 }
 0x104   : > { %v662_v55 = vpop.f32.mrf.mxu0  ;;  %v1062_v58 = vpack.c.b16 %v2707_v53, %v2709_v56 }
 0x105   : > { %v712_v57 = vmul.f32 %v2674_v25, %v662_v55  ;;  %v1094_v5 = vunpack.c.l.b16 %v984_v60 }
 0x107   : > { %v736_v59 = vadd.f32 %v2681_v28, %v712_v57 }
 0x109   : > { %v756_v62 = vmax.f32 %v736_v59, 0.0 }
 0x10b   : > { %v836_v0 = vrot.slane %v756_v62, 7  ;;  %v879_v1 = vrot.slane %v756_v62, 1  ;;  %v985_v2 = vpack.c.bf16 %v756_v62, %v756_v62 }
 0x10c   : > { %v665_v4 = vpop.f32.mrf.mxu0 }
 0x10d   : > { %v713_v6 = vmul.f32 %v2674_v25, %v665_v4  ;;  %v1095_v7 = vunpack.c.l.b16 %v985_v2  ;;  %v890_v8 = vsel %vm888_vm4, %v869_v63, %v879_v1  ;;  %v900_v9 = vsel %vm888_vm4, %v879_v1, %v869_v63 }
 0x10e   : > { %v945_v12 = vsel %vm937_vm5, 0.0, %v900_v9  ;;  %v1004_v13 = vpack.c.bf16 %v890_v8, %v890_v8  ;;  %v849_v15 = vsel %vm847_vm2, %v826_v3, %v836_v0  ;;  %v859_v19 = vsel %vm847_vm2, %v836_v0, %v826_v3 }
 0x10f   : > { %v737_v16 = vadd.f32 %v2681_v28, %v713_v6  ;;  %v1113_v17 = vpack.c.b16 %v1095_v7, %v1094_v5  ;;  %v1005_v18 = vpack.c.bf16 %v945_v12, %v945_v12  ;;  %v918_v21 = vsel %vm910_vm3, 0.0, %v859_v19 }
 0x110   : > { %v1164_v20 = vunpack.c.l.b16 %v1004_v13  ;;  %v965_v22 = vpack.c.bf16 %v849_v15, %v849_v15  ;;  %v964_v24 = vpack.c.bf16 %v918_v21, %v918_v21 }
 0x111   : > { %1124 = vrot.lane.b32.xlu0 %v1113_v17, %s2315_s0  ;;  %v1165_v23 = vunpack.c.l.b16 %v1005_v18  ;;  %v757_v27 = vmax.f32 %v737_v16, 0.0 }
 0x112   : > { %v2740_v26 = vunpack.c.l.b16 %v965_v22  ;;  %v2742_v31 = vunpack.c.l.b16 %v964_v24  ;;  %v878_v22 = vrot.slane %v2690_v39, 1 }
 0x113   : > { %v1183_v29 = vpack.c.b16 %v1165_v23, %v1164_v20  ;;  %v986_v35 = vpack.c.bf16 %v757_v27, %v757_v27  ;;  %v870_v37 = vrot.slane %v757_v27, 1  ;;  %v827_v17 = vrot.slane %v757_v27, 7 }
 0x114   : > { %v667_v30 = vpop.f32.mrf.mxu0  ;;  %v1063_v33 = vpack.c.b16 %v2740_v26, %v2742_v31 }
 0x115   : > { %v714_v32 = vmul.f32 %v2674_v25, %v667_v30  ;;  %1194 = vrot.lane.b32.xlu1 %v1183_v29, %s2316_s27  ;;  %v1096_v43 = vunpack.c.l.b16 %v986_v35  ;;  %v983_v35 = vpack.c.bf16 %v2690_v39, %v2690_v39 }
 0x117   : > { %v738_v34 = vadd.f32 %v2681_v28, %v714_v32 }
 0x119   : > { %v758_v40 = vmax.f32 %v738_v34, 0.0 }
 0x11b   : > { %v880_v41 = vrot.slane %v758_v40, 1  ;;  %v987_v42 = vpack.c.bf16 %v758_v40, %v758_v40  ;;  %v837_v18 = vrot.slane %v758_v40, 7  ;;  %v868_v40 = vrot.slane %v2688_v38, 1 }
 0x11c   : > { %v670_v44 = vpop.f32.mrf.mxu0 }
 0x11d   : > { %v715_v45 = vmul.f32 %v2674_v25, %v670_v44  ;;  %v1097_v46 = vunpack.c.l.b16 %v987_v42  ;;  %v891_v47 = vsel %vm888_vm4, %v870_v37, %v880_v41  ;;  %v901_v48 = vsel %vm888_vm4, %v880_v41, %v870_v37 }
 0x11e   : > { %v947_v49 = vsel %vm937_vm5, 0.0, %v901_v48  ;;  %v1006_v50 = vpack.c.bf16 %v891_v47, %v891_v47  ;;  %v850_v24 = vsel %vm847_vm2, %v827_v17, %v837_v18  ;;  %v860_v29 = vsel %vm847_vm2, %v837_v18, %v827_v17 }
 0x11f   : > { %v739_v51 = vadd.f32 %v2681_v28, %v715_v45  ;;  %v1114_v52 = vpack.c.b16 %v1097_v46, %v1096_v43  ;;  %v1007_v54 = vpack.c.bf16 %v947_v49, %v947_v49  ;;  %v920_v27 = vsel %vm910_vm3, 0.0, %v860_v29 }
 0x120   : > { %v1166_v55 = vunpack.c.l.b16 %v1006_v50  ;;  %v967_v34 = vpack.c.bf16 %v850_v24, %v850_v24  ;;  %v966_v37 = vpack.c.bf16 %v920_v27, %v920_v27  ;;  %v982_v44 = vpack.c.bf16 %v2688_v38, %v2688_v38 }
 0x121   : > { %1126 = vrot.lane.b32.xlu0 %v1114_v52, %s2315_s0  ;;  %v1167_v57 = vunpack.c.l.b16 %v1007_v54  ;;  %v2758_v59 = vmax.f32 %v739_v51, 0.0  ;;  %v899_v39 = vsel %vm888_vm4, %v878_v22, %v868_v40  ;;  %v1093_v48 = vunpack.c.l.b16 %v983_v35 }
 0x122   : > { %v2796_v43 = vunpack.c.l.b16 %v967_v34  ;;  %v2800_v45 = vunpack.c.l.b16 %v966_v37  ;;  %v889_v38 = vsel %vm888_vm4, %v868_v40, %v878_v22 }
 0x123   : > { %v1184_v60 = vpack.c.b16 %v1167_v57, %v1166_v55  ;;  %v988_v1 = vpack.c.bf16 %v2758_v59, %v2758_v59  ;;  %v871_v2 = vrot.slane %v2758_v59, 1  ;;  %v1092_v55 = vunpack.c.l.b16 %v982_v44 }
 0x124   : > { %v672_v62 = vpop.f32.mrf.mxu0  ;;  %v1064_v49 = vpack.c.b16 %v2796_v43, %v2800_v45  ;;  %v943_v57 = vsel %vm937_vm5, 0.0, %v899_v39 }
 0x125   : > { %v716_v63 = vmul.f32 %v2674_v25, %v672_v62  ;;  %1196 = vrot.lane.b32.xlu1 %v1184_v60, %s2316_s27  ;;  %v1098_v6 = vunpack.c.l.b16 %v988_v1  ;;  %v1112_v1 = vpack.c.b16 %v1093_v48, %v1092_v55 }
 0x127   : > { %v740_v0 = vadd.f32 %v2681_v28, %v716_v63 }
 0x129   : > { %v2766_v3 = vmax.f32 %v740_v0, 0.0 }
 0x12b   : > { %v881_v4 = vrot.slane %v2766_v3, 1  ;;  %v989_v5 = vpack.c.bf16 %v2766_v3, %v2766_v3 }
 0x12c   : > { %v675_v7 = vpop.f32.mrf.mxu0 }
 0x12d   : > { %v717_v8 = vmul.f32 %v2674_v25, %v675_v7  ;;  %v1099_v9 = vunpack.c.l.b16 %v989_v5  ;;  %v892_v10 = vsel %vm888_vm4, %v871_v2, %v881_v4  ;;  %v902_v11 = vsel %vm888_vm4, %v881_v4, %v871_v2 }
 0x12e   : > { %v949_v12 = vsel %vm937_vm5, 0.0, %v902_v11  ;;  %v1008_v13 = vpack.c.bf16 %v892_v10, %v892_v10  ;;  %v1002_v5 = vpack.c.bf16 %v889_v38, %v889_v38  ;;  %v828_v10 = vrot.slane %v2758_v59, 7 }
 0x12f   : > { %v741_v14 = vadd.f32 %v2681_v28, %v717_v8  ;;  %v1115_v15 = vpack.c.b16 %v1099_v9, %v1098_v6  ;;  %v1009_v16 = vpack.c.bf16 %v949_v12, %v949_v12  ;;  %v1003_v9 = vpack.c.bf16 %v943_v57, %v943_v57 }
 0x130   : > { %v1168_v19 = vunpack.c.l.b16 %v1008_v13  ;;  %v838_v11 = vrot.slane %v2766_v3, 7 }
 0x131   : > { %1128 = vrot.lane.b32.xlu2 %v1115_v15, %s2315_s0  ;;  %v1169_v20 = vunpack.c.l.b16 %v1009_v16  ;;  %v2780_v21 = vmax.f32 %v741_v14, 0.0  ;;  %v1162_v16 = vunpack.c.l.b16 %v1002_v5  ;;  %v1163_v17 = vunpack.c.l.b16 %v1003_v9 }
 0x133   : > { %v1185_v32 = vpack.c.b16 %v1169_v20, %v1168_v19  ;;  %v990_v42 = vpack.c.bf16 %v2780_v21, %v2780_v21  ;;  %v872_v46 = vrot.slane %v2780_v21, 1  ;;  %v851_v19 = vsel %vm847_vm2, %v828_v10, %v838_v11 }
 0x134   : > { %v677_v23 = vpop.f32.mrf.mxu0  ;;  %v861_v20 = vsel %vm847_vm2, %v838_v11, %v828_v10  ;;  %v969_v22 = vpack.c.bf16 %v851_v19, %v851_v19  ;;  %v1182_v29 = vpack.c.b16 %v1163_v17, %v1162_v16 }
 0x135   : > { %v718_v30 = vmul.f32 %v2674_v25, %v677_v23  ;;  %v1100_v52 = vunpack.c.l.b16 %v990_v42  ;;  %v922_v3 = vsel %vm910_vm3, 0.0, %v861_v20  ;;  %v829_v42 = vrot.slane %v2780_v21, 7 }
 0x136   : > { %v968_v23 = vpack.c.bf16 %v922_v3, %v922_v3 }
 0x137   : > { %v742_v41 = vadd.f32 %v2681_v28, %v718_v30 }
 0x138   : > { %v2835_v27 = vunpack.c.l.b16 %v968_v23 }
 0x139   : > { %v762_v47 = vmax.f32 %v742_v41, 0.0  ;;  %1198 = vrot.lane.b32.xlu2 %v1185_v32, %s2316_s27  ;;  %v2833_v32 = vunpack.c.l.b16 %v969_v22 }
 0x13b   : > { %v882_v50 = vrot.slane %v762_v47, 1  ;;  %v991_v51 = vpack.c.bf16 %v762_v47, %v762_v47  ;;  %v1065_v35 = vpack.c.b16 %v2833_v32, %v2835_v27  ;;  %v839_v44 = vrot.slane %v762_v47, 7 }
 0x13c   : > { %v680_v54 = vpop.f32.mrf.mxu0 }
 0x13d   : > { %v719_v60 = vmul.f32 %v2674_v25, %v680_v54  ;;  %v1101_v62 = vunpack.c.l.b16 %v991_v51  ;;  %v893_v63 = vsel %vm888_vm4, %v872_v46, %v882_v50  ;;  %v903_v0 = vsel %vm888_vm4, %v882_v50, %v872_v46 }
 0x13e   : > { %v951_v2 = vsel %vm937_vm5, 0.0, %v903_v0  ;;  %v1010_v4 = vpack.c.bf16 %v893_v63, %v893_v63  ;;  %v862_v39 = vsel %vm847_vm2, %v839_v44, %v829_v42  ;;  %v852_v48 = vsel %vm847_vm2, %v829_v42, %v839_v44 }
 0x13f   : > { %v743_v6 = vadd.f32 %v2681_v28, %v719_v60  ;;  %v1116_v7 = vpack.c.b16 %v1101_v62, %v1100_v52  ;;  %v1011_v8 = vpack.c.bf16 %v951_v2, %v951_v2  ;;  %v924_v50 = vsel %vm910_vm3, 0.0, %v862_v39 }
 0x140   : > { %v1170_v12 = vunpack.c.l.b16 %v1010_v4  ;;  %v970_v51 = vpack.c.bf16 %v924_v50, %v924_v50  ;;  %v971_v52 = vpack.c.bf16 %v852_v48, %v852_v48 }
 0x141   : > { %1122 = vrot.lane.b32.xlu2 %v1112_v1, %s2315_s0  ;;  %1130 = vrot.lane.b32.xlu0 %v1116_v7, %s2315_s0  ;;  %v1171_v13 = vunpack.c.l.b16 %v1011_v8  ;;  %v763_v14 = vmax.f32 %v743_v6, 0.0  ;;  %v690_v6 = vpop.f32.mrf.mxu3 }
 0x142   : > { %v2848_v38 = vunpack.c.l.b16 %v970_v51  ;;  %v2850_v54 = vunpack.c.l.b16 %v971_v52 }
 0x143   : > { %v1186_v15 = vpack.c.b16 %v1171_v13, %v1170_v12  ;;  %v992_v30 = vpack.c.bf16 %v763_v14, %v763_v14  ;;  %v830_v47 = vrot.slane %v763_v14, 7  ;;  %v873_v7 = vrot.slane %v763_v14, 1 }
 0x144   : > { %v682_v18 = vpop.f32.mrf.mxu0  ;;  %v1066_v21 = vpack.c.b16 %v2850_v54, %v2848_v38 }
 0x145   : > { %v720_v59 = vmul.f32 %v2674_v25, %v682_v18  ;;  %1200 = vrot.lane.b32.xlu1 %v1186_v15, %s2316_s27  ;;  %v1102_v40 = vunpack.c.l.b16 %v992_v30  ;;  %v723_v15 = vmul.f32 %v2674_v25, %v690_v6 }
 0x147   : > { %v744_v24 = vadd.f32 %v2681_v28, %v720_v59  ;;  %v747_v23 = vadd.f32 %v2681_v28, %v723_v15 }
 0x149   : > { %v764_v34 = vmax.f32 %v744_v24, 0.0  ;;  %1192 = vrot.lane.b32.xlu0 %v1182_v29, %s2316_s27  ;;  %v692_v10 = vpop.f32.mrf.mxu3  ;;  %v2893_v31 = vmax.f32 %v747_v23, 0.0 }
 0x14a   : > { %v724_v17 = vmul.f32 %v2674_v25, %v692_v10 }
 0x14b   : > { %v993_v37 = vpack.c.bf16 %v764_v34, %v764_v34  ;;  %v840_v55 = vrot.slane %v764_v34, 7  ;;  %v883_v8 = vrot.slane %v764_v34, 1  ;;  %v875_v39 = vrot.slane %v2893_v31, 1 }
 0x14c   : > { %v685_v5 = vpop.f32.mrf.mxu0  ;;  %v748_v29 = vadd.f32 %v2681_v28, %v724_v17  ;;  %v996_v23 = vpack.c.bf16 %v2893_v31, %v2893_v31 }
 0x14d   : > { %v1103_v41 = vunpack.c.l.b16 %v993_v37  ;;  %v863_v57 = vsel %vm847_vm2, %v840_v55, %v830_v47  ;;  %v853_v60 = vsel %vm847_vm2, %v830_v47, %v840_v55  ;;  %v721_v11 = vmul.f32 %v2674_v25, %v685_v5 }
 0x14e   : > { %v926_v62 = vsel %vm910_vm3, 0.0, %v863_v57  ;;  %v973_v0 = vpack.c.bf16 %v853_v60, %v853_v60  ;;  %v904_v13 = vsel %vm888_vm4, %v883_v8, %v873_v7  ;;  %v894_v16 = vsel %vm888_vm4, %v873_v7, %v883_v8 }
 0x14f   : > { %v1117_v46 = vpack.c.b16 %v1103_v41, %v1102_v40  ;;  %v972_v63 = vpack.c.bf16 %v926_v62, %v926_v62  ;;  %v953_v14 = vsel %vm937_vm5, 0.0, %v904_v13  ;;  %v745_v19 = vadd.f32 %v2681_v28, %v721_v11 }
 0x150   : > { %v2862_v2 = vunpack.c.l.b16 %v973_v0  ;;  %v1012_v59 = vpack.c.bf16 %v894_v16, %v894_v16  ;;  %v1013_v24 = vpack.c.bf16 %v953_v14, %v953_v14  ;;  %v2895_v41 = vmax.f32 %v748_v29, 0.0 }
 0x151   : > { %1132 = vrot.lane.b32.xlu0 %v1117_v46, %s2315_s0  ;;  %v2860_v1 = vunpack.c.l.b16 %v972_v63  ;;  %v2887_v34 = vmax.f32 %v745_v19, 0.0  ;;  %v695_v46 = vpop.f32.mrf.mxu3 }
 0x152   : > { %v1173_v40 = vunpack.c.l.b16 %v1013_v24  ;;  %v885_v50 = vrot.slane %v2895_v41, 1  ;;  %v725_v16 = vmul.f32 %v2674_v25, %v695_v46  ;;  %v997_v24 = vpack.c.bf16 %v2895_v41, %v2895_v41 }
 0x153   : > { %v1067_v4 = vpack.c.b16 %v2862_v2, %v2860_v1  ;;  %v994_v42 = vpack.c.bf16 %v2887_v34, %v2887_v34  ;;  %v874_v47 = vrot.slane %v2887_v34, 1 }
 0x154   : > { %v687_v9 = vpop.f32.mrf.mxu0  ;;  %v906_v62 = vsel %vm888_vm4, %v885_v50, %v875_v39  ;;  %v896_v32 = vsel %vm888_vm4, %v875_v39, %v885_v50 }
 0x155   : > { %v722_v12 = vmul.f32 %v2674_v25, %v687_v9  ;;  %v1104_v51 = vunpack.c.l.b16 %v994_v42  ;;  %v957_v27 = vsel %vm937_vm5, 0.0, %v906_v62  ;;  %v1016_v10 = vpack.c.bf16 %v896_v32, %v896_v32  ;;  %v1343_v42 = vld [vmem:[%s3426_s8 + $0x10] sm:$0x3] }
 0x156   : > { %v1017_v11 = vpack.c.bf16 %v957_v27, %v957_v27 }
 0x157   : > { %v746_v20 = vadd.f32 %v2681_v28, %v722_v12 }
 0x158   : > { %v1177_v12 = vunpack.c.l.b16 %v1017_v11 }
 0x159   : > { %v2891_v37 = vmax.f32 %v746_v20, 0.0  ;;  %v697_v8 = vpop.f32.mrf.mxu3 }
 0x15a   : > { %v726_v19 = vmul.f32 %v2674_v25, %v697_v8 }
 0x15b   : > { %v995_v44 = vpack.c.bf16 %v2891_v37, %v2891_v37  ;;  %v884_v57 = vrot.slane %v2891_v37, 1 }
 0x15d   : > { %v1105_v52 = vunpack.c.l.b16 %v995_v44  ;;  %v905_v7 = vsel %vm888_vm4, %v884_v57, %v874_v47  ;;  %v895_v43 = vsel %vm888_vm4, %v874_v47, %v884_v57  ;;  %v1353_v44 = vunpack.c.l.b16 %v1343_v42 }
 0x15e   : > { %v955_v45 = vsel %vm937_vm5, 0.0, %v905_v7  ;;  %v1014_v13 = vpack.c.bf16 %v895_v43, %v895_v43  ;;  %v831_v42 = vrot.slane %v2887_v34, 7 }
 0x15f   : > { %v1118_v5 = vpack.c.b16 %v1105_v52, %v1104_v51  ;;  %v1015_v15 = vpack.c.bf16 %v955_v45, %v955_v45  ;;  %v1356_v50 = vpack.c.b16 %v1353_v44, %v1353_v44  ;;  %v841_v44 = vrot.slane %v2891_v37, 7 }
 0x161   : > { %v1175_v14 = vunpack.c.l.b16 %v1015_v15  ;;  %v700_v20 = vpop.f32.mrf.mxu3 }
 0x183   : > { %v1125_v18 = vpop.permute.xlu0 %1124 }
 0x184   : > { %v1218_v3 = vsel %vm1212_vm6, %v1063_v33, %v1125_v18  ;;  %v1172_v33 = vunpack.c.l.b16 %v1012_v59  ;;  %v1174_v18 = vunpack.c.l.b16 %v1014_v13  ;;  %v749_v59 = vadd.f32 %v2681_v28, %v725_v16 }
 0x185   : > { %v832_v16 = vrot.slane %v2893_v31, 7 }
 0x186   : > { %v1187_v48 = vpack.c.b16 %v1173_v40, %v1172_v33  ;;  %v2950_v29 = vmax.f32 %v749_v59, 0.0  ;;  %v1106_v33 = vunpack.c.l.b16 %v996_v23  ;;  %v1107_v40 = vunpack.c.l.b16 %v997_v24 }
 0x187   : > { %v1195_v22 = vpop.permute.xlu1 %1194 }
 0x188   : > { %v2885_v30 = vsel %vm1243_vm7, %v1218_v3, %v1195_v22  ;;  %v1188_v3 = vpack.c.b16 %v1175_v14, %v1174_v18  ;;  %v750_v22 = vadd.f32 %v2681_v28, %v726_v19  ;;  %v876_v46 = vrot.slane %v2950_v29, 1 }
 0x189   : > { %1272 = vrot.lane.b32.xlu1 %v2885_v30, %s2317_s14  ;;  %v1119_v51 = vpack.c.b16 %v1107_v40, %v1106_v33  ;;  %v998_v52 = vpack.c.bf16 %v2950_v29, %v2950_v29 }
 0x18b   : > { %v1129_v26 = vpop.permute.xlu2 %1128 }
 0x18c   : > { %v1224_v55 = vsel %vm1212_vm6, %v1065_v35, %v1129_v26  ;;  %v2953_v26 = vmax.f32 %v750_v22, 0.0 }
 0x18e   : > { %v886_v39 = vrot.slane %v2953_v26, 1  ;;  %v999_v47 = vpack.c.bf16 %v2953_v26, %v2953_v26 }
 0x190   : > { %v907_v62 = vsel %vm888_vm4, %v886_v39, %v876_v46 }
 0x191   : > { %1202 = vrot.lane.b32.xlu1 %v1187_v48, %s2316_s27  ;;  %v702_v48 = vpop.f32.mrf.mxu3 }
 0x192   : > { %v728_v57 = vmul.f32 %v2674_v25, %v702_v48  ;;  %v864_v48 = vsel %vm847_vm2, %v841_v44, %v831_v42 }
 0x193   : > { %v1199_v60 = vpop.permute.xlu2 %1198  ;;  %v1127_v63 = vpop.permute.xlu0 %1126 }
 0x194   : > { %v2913_v0 = vsel %vm1243_vm7, %v1224_v55, %v1199_v60  ;;  %v1221_v35 = vsel %vm1212_vm6, %v1064_v49, %v1127_v63  ;;  %v1176_v49 = vunpack.c.l.b16 %v1016_v10  ;;  %v727_v55 = vmul.f32 %v2674_v25, %v700_v20 }
 0x195   : > { %1291 = vrot.lane.b32.xlu0 %v2913_v0, %s2318_s4  ;;  %v1378_v60 = vsel %vm1376_vm8, %v1356_v50, 0  ;;  %v1108_v63 = vunpack.c.l.b16 %v998_v52  ;;  %v752_v27 = vadd.f32 %v2681_v28, %v728_v57  ;;  %v959_v25 = vsel %vm937_vm5, 0.0, %v907_v62 }
 0x196   : > { %v1189_v17 = vpack.c.b16 %v1177_v12, %v1176_v49  ;;  %1385 = vmatpush.bf16.msra.mxu1 %v1378_v60  ;;  %1898 = vmatpush.bf16.msrb.mxu3 %v1378_v60  ;;  %v751_v32 = vadd.f32 %v2681_v28, %v727_v55  ;;  %v1019_v11 = vpack.c.bf16 %v959_v25, %v959_v25 }
 0x197   : > { %v1197_v6 = vpop.permute.xlu1 %1196  ;;  %v772_v45 = vmax.f32 %v752_v27, 0.0  ;;  %v854_v50 = vsel %vm847_vm2, %v831_v42, %v841_v44 }
 0x198   : > { %v2928_v9 = vsel %vm1243_vm7, %v1221_v35, %v1197_v6  ;;  %v897_v35 = vsel %vm888_vm4, %v876_v46, %v886_v39  ;;  %v801_v6 = vstv %s800_s5  ;;  %v771_v43 = vmax.f32 %v751_v32, 0.0  ;;  %v1895_v32 = vld [vmem:[%s3426_s8 + $0x8] sm:$0xff] }
 0x199   : > { %1289 = vrot.lane.b32.xlu2 %v2928_v9, %s2318_s4  ;;  %1134 = vrot.lane.b32.xlu1 %v1118_v5, %s2315_s0  ;;  %v1109_v5 = vunpack.c.l.b16 %v999_v47  ;;  %v1018_v10 = vpack.c.bf16 %v897_v35, %v897_v35  ;;  %vm802_vm9 = vcmp.eq.s32.totalorder %v801_v6, 1  ;;  %v1179_v15 = vunpack.c.l.b16 %v1019_v11  ;;  %v1894_v35 = vld [vmem:[%s3426_s8] sm:$0xff] }
 0x19a   : > { %v823_v18 = vsel %vm802_vm9, 0.0, %v771_v43  ;;  %v824_v14 = vsel %vm802_vm9, 0.0, %v772_v45  ;;  %v833_v46 = vrot.slane %v2950_v29, 7  ;;  %v843_v39 = vrot.slane %v2953_v26, 7  ;;  %1386 = vmatpush.bf16.msra.mxu1 %v1895_v32  ;;  %1899 = vmatpush.bf16.msrb.mxu3 %v1895_v32 }
 0x19b   : > { %v1120_v8 = vpack.c.b16 %v1109_v5, %v1108_v63  ;;  %v1178_v13 = vunpack.c.l.b16 %v1018_v10  ;;  %v1000_v54 = vpack.c.bf16 %v823_v18, %v823_v18  ;;  %v975_v47 = vpack.c.bf16 %v854_v50, %v854_v50 }
 0x19c   : > { %v866_v55 = vsel %vm847_vm2, %v843_v39, %v833_v46  ;;  %v856_v29 = vsel %vm847_vm2, %v833_v46, %v843_v39  ;;  %v834_v25 = vrot.slane %v823_v18, 7  ;;  %v877_v6 = vrot.slane %v823_v18, 1 }
 0x19d   : > { %1276 = vrot.lane.b32.xlu0 %v2913_v0, %s2317_s14  ;;  %v1190_v38 = vpack.c.b16 %v1179_v15, %v1178_v13  ;;  %v1110_v31 = vunpack.c.l.b16 %v1000_v54  ;;  %v1055_v37 = vunpack.c.l.b16 %v975_v47  ;;  %v932_v26 = vsel %vm910_vm3, 0.0, %v866_v55 }
 0x19e   : > { %v978_v60 = vpack.c.bf16 %v932_v26, %v932_v26  ;;  %v979_v62 = vpack.c.bf16 %v856_v29, %v856_v29  ;;  %1387 = vmatpush.bf16.msra.mxu1 %v1894_v35  ;;  %1900 = vmatpush.bf16.msrb.mxu3 %v1894_v35  ;;  %v1493_v26 = vld [vmem:[%s3427_s30] sm:$0x3]  ;;  %s1889_s30 = sshll.u32 %s1671_s24, 3 }
 0x1a0   : > { %v3024_v63 = vunpack.c.l.b16 %v978_v60  ;;  %v3026_v5 = vunpack.c.l.b16 %v979_v62 }
 0x1a1   : > { %1274 = vrot.lane.b32.xlu2 %v2928_v9, %s2317_s14 }
 0x1a2   : > { %v1070_v27 = vpack.c.b16 %v3026_v5, %v3024_v63 }
 0x1a5   : > { %1206 = vrot.lane.b32.xlu0 %v1189_v17, %s2316_s27  ;;  %v842_v17 = vrot.slane %v2895_v41, 7 }
 0x1a7   : > { %v865_v19 = vsel %vm847_vm2, %v842_v17, %v832_v16  ;;  %v855_v20 = vsel %vm847_vm2, %v832_v16, %v842_v17 }
 0x1a8   : > { %v930_v59 = vsel %vm910_vm3, 0.0, %v865_v19  ;;  %v977_v22 = vpack.c.bf16 %v855_v20, %v855_v20  ;;  %v1123_v19 = vpop.permute.xlu2 %1122 }
 0x1a9   : > { %1204 = vrot.lane.b32.xlu2 %v1188_v3, %s2316_s27  ;;  %v976_v3 = vpack.c.bf16 %v930_v59, %v930_v59  ;;  %v1215_v36 = vsel %vm1212_vm6, %v1062_v58, %v1123_v19 }
 0x1aa   : > { %v3000_v24 = vunpack.c.l.b16 %v977_v22 }
 0x1ab   : > { %v2998_v23 = vunpack.c.l.b16 %v976_v3 }
 0x1ad   : > { %v1069_v33 = vpack.c.b16 %v3000_v24, %v2998_v23 }
 0x1b1   : > { %1136 = vrot.lane.b32.xlu2 %v1119_v51, %s2315_s0  ;;  %v928_v51 = vsel %vm910_vm3, 0.0, %v864_v48 }
 0x1b2   : > { %v974_v52 = vpack.c.bf16 %v928_v51, %v928_v51 }
 0x1b3   : > { %v1131_v7 = vpop.permute.xlu0 %1130 }
 0x1b4   : > { %v1227_v49 = vsel %vm1212_vm6, %v1066_v21, %v1131_v7  ;;  %v1001_v21 = vpack.c.bf16 %v824_v14, %v824_v14  ;;  %v3015_v34 = vunpack.c.l.b16 %v974_v52  ;;  %v844_v7 = vrot.slane %v824_v14, 7 }
 0x1b6   : > { %v1111_v41 = vunpack.c.l.b16 %v1001_v21  ;;  %v1068_v57 = vpack.c.b16 %v1055_v37, %v3015_v34  ;;  %v867_v11 = vsel %vm847_vm2, %v844_v7, %v834_v25 }
 0x1b7   : > { %v1201_v28 = vpop.permute.xlu1 %1200 }
 0x1b8   : > { %v2982_v12 = vsel %vm1243_vm7, %v1227_v49, %v1201_v28  ;;  %v1121_v40 = vpack.c.b16 %v1111_v41, %v1110_v31  ;;  %v857_v49 = vsel %vm847_vm2, %v834_v25, %v844_v7  ;;  %v934_v28 = vsel %vm910_vm3, 0.0, %v867_v11 }
 0x1b9   : > { %1293 = vrot.lane.b32.xlu1 %v2982_v12, %s2318_s4  ;;  %1138 = vrot.lane.b32.xlu2 %v1120_v8, %s2315_s0  ;;  %v887_v8 = vrot.slane %v824_v14, 1  ;;  %v980_v16 = vpack.c.bf16 %v934_v28, %v934_v28  ;;  %v981_v17 = vpack.c.bf16 %v857_v49, %v857_v49 }
 0x1bb   : > { %v908_v10 = vsel %vm888_vm4, %v887_v8, %v877_v6  ;;  %v898_v43 = vsel %vm888_vm4, %v877_v6, %v887_v8  ;;  %v3050_v54 = vunpack.c.l.b16 %v981_v17  ;;  %v1193_v59 = vpop.permute.xlu0 %1192 }
 0x1bc   : > { %v961_v45 = vsel %vm937_vm5, 0.0, %v908_v10  ;;  %v1020_v13 = vpack.c.bf16 %v898_v43, %v898_v43  ;;  %v1245_v3 = vsel %vm1243_vm7, %v1215_v36, %v1193_v59 }
 0x1bd   : > { %v1021_v15 = vpack.c.bf16 %v961_v45, %v961_v45 }
 0x1be   : > { %v1180_v18 = vunpack.c.l.b16 %v1020_v13 }
 0x1bf   : > { %v1181_v14 = vunpack.c.l.b16 %v1021_v15 }
 0x1c1   : > { %1278 = vrot.lane.b32.xlu1 %v2982_v12, %s2317_s14  ;;  %1208 = vrot.lane.b32.xlu2 %v1190_v38, %s2316_s27  ;;  %v3048_v38 = vunpack.c.l.b16 %v980_v16  ;;  %v1191_v21 = vpack.c.b16 %v1181_v14, %v1180_v18 }
 0x1c3   : > { %v1071_v61 = vpack.c.b16 %v3050_v54, %v3048_v38  ;;  %v1133_v42 = vpop.permute.xlu0 %1132 }
 0x1c4   : > { %v1230_v53 = vsel %vm1212_vm6, %v1067_v4, %v1133_v42 }
 0x1c9   : > { %1140 = vrot.lane.b32.xlu1 %v1121_v40, %s2315_s0 }
 0x1f3   : > { %v1290_v20 = vpop.permute.xlu2 %1289 }
 0x1fb   : > { %v1275_v22 = vpop.permute.xlu2 %1274  ;;  %v1273_v31 = vpop.permute.xlu1 %1272 }
 0x1fc   : > { %v1307_v41 = vsel %vm1305_vm10, %v1245_v3, %v1273_v31  ;;  %v1309_v50 = vsel %vm1305_vm10, %v2885_v30, %v1275_v22 }
 0x1fd   : > { %v1324_v40 = vsel %vm1322_vm11, %v1307_v41, %v1290_v20 }
 0x1fe   : > { %1869 = vmatmul.msk.bf16.vlgmr.msra.gmra.mxu1 %vm1359_vm12, %v1324_v40 }
 0x203   : > { %v1203_v56 = vpop.permute.xlu1 %1202  ;;  %v1205_v58 = vpop.permute.xlu2 %1204 }
 0x204   : > { %v3067_v44 = vsel %vm1243_vm7, %v1230_v53, %v1203_v56 }
 0x205   : > { %1295 = vrot.lane.b32.xlu0 %v3067_v44, %s2318_s4  ;;  %1280 = vrot.lane.b32.xlu1 %v3067_v44, %s2317_s14 }
 0x207   : > { %v1292_v46 = vpop.permute.xlu0 %1291 }
 0x208   : > { %v1326_v2 = vsel %vm1322_vm11, %v1309_v50, %v1292_v46 }
 0x20b   : > { %v1135_v39 = vpop.permute.xlu1 %1134  ;;  %v1137_v48 = vpop.permute.xlu2 %1136 }
 0x20c   : > { %v1233_v1 = vsel %vm1212_vm6, %v1068_v57, %v1135_v39  ;;  %v1236_v30 = vsel %vm1212_vm6, %v1069_v33, %v1137_v48  ;;  %v1519_v57 = vsel %vm1376_vm8, %v1493_v26, 0 }
 0x20d   : > { %1210 = vrot.lane.b32.xlu0 %v1191_v21, %s2316_s27  ;;  %v3079_v4 = vsel %vm1243_vm7, %v1233_v1, %v1205_v58  ;;  %1528 = vmatpush.bf16.msra.mxu2 %v1519_v57 }
 0x20e   : > { %1870 = vmatmul.msk.bf16.gmra.mxu1 %vm1359_vm12, %v1326_v2  ;;  %1297 = vrot.lane.b32.xlu2 %v3079_v4, %s2318_s4 }
 0x20f   : > { %v1277_v51 = vpop.permute.xlu0 %1276  ;;  %1901 = vmatpush.bf16.msra.mxu3 %v1519_v57 }
 0x210   : > { %v1311_v23 = vsel %vm1305_vm10, %v2928_v9, %v1277_v51 }
 0x213   : > { %v1139_v52 = vpop.permute.xlu2 %1138 }
 0x214   : > { %v1239_v37 = vsel %vm1212_vm6, %v1070_v27, %v1139_v52  ;;  %v3119_v27 = vld [vmem:[%s3428_s3] ss:$0 sm:$0xff]  ;;  %s1673_s3 = scalar_lea.hbm %s3433_s9, %s1889_s30 }
 0x215   : > { %1282 = vrot.lane.b32.xlu0 %v3079_v4, %s2317_s14  ;;  %s1676_s0 = sshll.u32 %s1673_s3, 4  ;;  %s1677_s0 = int_to_ptr.hbm [resolvable:$true] %s1676_s0 }
 0x217   : > { %v1207_v47 = vpop.permute.xlu0 %1206 }
 0x218   : > { %v3091_v34 = vsel %vm1243_vm7, %v1236_v30, %v1207_v47 }
 0x219   : > { %1299 = vrot.lane.b32.xlu1 %v3091_v34, %s2318_s4 }
 0x21b   : > { %v1209_v55 = vpop.permute.xlu2 %1208 }
 0x21c   : > { %v1261_v29 = vsel %vm1243_vm7, %v1239_v37, %v1209_v55 }
 0x21d   : > { %1286 = vrot.lane.b32.xlu2 %v1261_v29, %s2317_s14 }
 0x221   : > { %1284 = vrot.lane.b32.xlu1 %v3091_v34, %s2317_s14  ;;  %s3429_s14 = sld [smem:[#allocation33_spill]] }
 0x225   : > { %1301 = vrot.lane.b32.xlu2 %v1261_v29, %s2318_s4 }
 0x22b   : > { %v1294_v24 = vpop.permute.xlu1 %1293 }
 0x22c   : > { %v1328_v33 = vsel %vm1322_vm11, %v1311_v23, %v1294_v24 }
 0x22d   : > { %1871 = vmatmul.msk.bf16.gmra.mxu1 %vm1359_vm12, %v1328_v33 }
 0x233   : > { %v1279_v60 = vpop.permute.xlu1 %1278 }
 0x234   : > { %v1313_v62 = vsel %vm1305_vm10, %v2913_v0, %v1279_v60  ;;  %v3126_v0 = vld [vmem:[%s3429_s14] ss:$0 sm:$0xff]  ;;  %s1659_s14 = scalar_lea.sflag [#allocation4], %s2620_s19 }
 0x235   : > { %v3169_v60 = vld [vmem:[%s3430_s26] ss:$0 sm:$0xff] }
 0x23b   : > { %v1141_v5 = vpop.permute.xlu1 %1140 }
 0x23c   : > { %v1242_v35 = vsel %vm1212_vm6, %v1071_v61, %v1141_v5 }
 0x268   : > { %v1298_v28 = vpop.permute.xlu2 %1297 }
 0x277   : > { %v1296_v63 = vpop.permute.xlu0 %1295  ;;  %v1281_v8 = vpop.permute.xlu1 %1280 }
 0x278   : > { %v1330_v9 = vsel %vm1322_vm11, %v1313_v62, %v1296_v63  ;;  %v1315_v45 = vsel %vm1305_vm10, %v2982_v12, %v1281_v8  ;;  %v1287_v31 = vpop.permute.xlu2 %1286  ;;  %v3174_v63 = vld [vmem:[%s3431_s17] ss:$0 sm:$0xff] }
 0x279   : > { %1872 = vmatmul.msk.bf16.gmra.mxu1 %vm1359_vm12, %v1330_v9  ;;  %v1332_v16 = vsel %vm1322_vm11, %v1315_v45, %v1298_v28 }
 0x27b   : > { %v1389_v32 = vpop.f32.mrf.mxu1 }
 0x27c   : > { %v1433_v6 = vmul.f32 %v3119_v27, %v1389_v32 }
 0x27e   : > { %v1453_v11 = vadd.f32 %v3126_v0, %v1433_v6 }
 0x27f   : > { %v1211_v25 = vpop.permute.xlu0 %1210 }
 0x280   : > { %v1263_v7 = vsel %vm1243_vm7, %v1242_v35, %v1211_v25  ;;  %v1469_v13 = vmax.f32 %v1453_v11, 0.0  ;;  %v1302_v42 = vpop.permute.xlu2 %1301 }
 0x281   : > { %1303 = vrot.lane.b32.xlu0 %v1263_v7, %s2318_s4  ;;  %s2171_s4 = sshra.s32 %s1677_s0, 4  ;;  %s2172_s4 = int_to_ptr.hbm [resolvable:$true] %s2171_s4 }
 0x282   : > { %s2173_s13 = scalar_lea.hbm %s2172_s4, 128  ;;  %p2178_p8 = scmp.lt.s32.totalorder %s2172_s4, %s3433_s9 }
 0x283   : > { %v1391_v10 = vpop.f32.mrf.mxu1  ;;  %p2174_p7 = scmp.ne.s32.totalorder %s2172_s4, %s2173_s13  ;;  %p2179_p9 = scmp.lt.s32.totalorder %s2177_s6, %s2173_s13 }
 0x284   : > { %v1434_v43 = vmul.f32 %v3119_v27, %v1391_v10  ;;  %v2051_v10 = vld [vmem:[%s2626_s20] sm:$0xff] }
 0x285   : > { %p2175_p3 = pnand %p2174_p7, %p2556_p4  ;;  %p2180_p10 = por %p2179_p9, %p2178_p8 }
 0x286   : > { %v1454_v49 = vadd.f32 %v3126_v0, %v1434_v43 }
 0x287   : > { %v1283_v54 = vpop.permute.xlu0 %1282  ;;  %p2176_p5 = pneg %p2175_p3 }
 0x288   : > { %v1470_v15 = vmax.f32 %v1454_v49, 0.0  ;;  %v1317_v20 = vsel %vm1305_vm10, %v3067_v44, %v1283_v54 }
 0x289   : > { %1873 = vmatmul.msk.bf16.gmra.mxu1 %vm1359_vm12, %v1332_v16  ;;  %p2181_p12 = pnand %p2180_p10, %p2176_p5 }
 0x28a   : > { %v1485_v17 = vpack.c.bf16 %v1470_v15, %v1469_v13 }
 0x28b   : > { %v1394_v18 = vpop.f32.mrf.mxu1  ;;  %v1300_v61 = vpop.permute.xlu1 %1299 }
 0x28c   : > { %1877 = vmatmul.msk.bf16.vlgmr.msra.gmra.mxu2 %vm1212_vm6, %v1485_v17  ;;  %v1435_v14 = vmul.f32 %v3119_v27, %v1394_v18  ;;  %v1334_v3 = vsel %vm1322_vm11, %v1317_v20, %v1300_v61  ;;  %v2052_v17 = vld [vmem:[%s2626_s20 + $0x8] sm:$0xff] }
 0x28e   : > { %v1455_v21 = vadd.f32 %v3126_v0, %v1435_v14 }
 0x290   : > { %v1471_v59 = vmax.f32 %v1455_v21, 0.0 }
 0x293   : > { %v1396_v38 = vpop.f32.mrf.mxu1  ;;  %v1285_v41 = vpop.permute.xlu1 %1284 }
 0x294   : > { %v1436_v12 = vmul.f32 %v3119_v27, %v1396_v38  ;;  %v1319_v40 = vsel %vm1305_vm10, %v3079_v4, %v1285_v41  ;;  %v1321_v4 = vsel %vm1305_vm10, %v3091_v34, %v1287_v31 }
 0x295   : > { %v1336_v53 = vsel %vm1322_vm11, %v1319_v40, %v1302_v42 }
 0x296   : > { %v1456_v19 = vadd.f32 %v3126_v0, %v1436_v12 }
 0x298   : > { %v1472_v36 = vmax.f32 %v1456_v19, 0.0 }
 0x299   : > { %1874 = vmatmul.msk.bf16.gmra.mxu1 %vm1359_vm12, %v1334_v3  ;;  %v2053_v3 = vld [vmem:[%s2626_s20 + $0x10] sm:$0xff] }
 0x29a   : > { %v1486_v22 = vpack.c.bf16 %v1472_v36, %v1471_v59 }
 0x29c   : > { %1878 = vmatmul.msk.bf16.gmra.mxu2 %vm1212_vm6, %v1486_v22 }
 0x2a9   : > { %1875 = vmatmul.msk.bf16.gmra.mxu1 %vm1359_vm12, %v1336_v53 }
 0x2aa   : > { %v1399_v56 = vpop.f32.mrf.mxu1 }
 0x2ab   : > { %v1437_v58 = vmul.f32 %v3119_v27, %v1399_v56 }
 0x2ad   : > { %v1457_v46 = vadd.f32 %v3126_v0, %v1437_v58 }
 0x2af   : > { %v1473_v50 = vmax.f32 %v1457_v46, 0.0 }
 0x2b2   : > { %v1401_v44 = vpop.f32.mrf.mxu1 }
 0x2b3   : > { %v1438_v39 = vmul.f32 %v3119_v27, %v1401_v44  ;;  %v2054_v44 = vld [vmem:[%s2626_s20 + $0x18] sm:$0xff] }
 0x2b5   : > { %v1458_v48 = vadd.f32 %v3126_v0, %v1438_v39 }
 0x2b7   : > { %v1474_v1 = vmax.f32 %v1458_v48, 0.0 }
 0x2b9   : > { %v1487_v2 = vpack.c.bf16 %v1474_v1, %v1473_v50 }
 0x2bb   : > { %1879 = vmatmul.msk.bf16.gmra.mxu2 %vm1212_vm6, %v1487_v2 }
 0x2f3   : > { %v1304_v51 = vpop.permute.xlu0 %1303 }
 0x2f4   : > { %v1338_v52 = vsel %vm1322_vm11, %v1321_v4, %v1304_v51 }
 0x2f5   : > { %1876 = vmatmul.msk.bf16.vlgmr.msrb.gmra.mxu3 %vm1359_vm12, %v1338_v52 }
 0x2f6   : > { %v1404_v30 = vpop.f32.mrf.mxu1 }
 0x2f7   : > { %v1439_v47 = vmul.f32 %v3119_v27, %v1404_v30 }
 0x2f9   : > { %v1459_v55 = vadd.f32 %v3126_v0, %v1439_v47 }
 0x2fb   : > { %v1475_v24 = vmax.f32 %v1459_v55, 0.0  ;;  %v2055_v55 = vld [vmem:[%s2626_s20 + $0x20] sm:$0xff] }
 0x2fe   : > { %v1406_v37 = vpop.f32.mrf.mxu1 }
 0x2ff   : > { %v1440_v29 = vmul.f32 %v3119_v27, %v1406_v37 }
 0x301   : > { %v1460_v23 = vadd.f32 %v3126_v0, %v1440_v29 }
 0x303   : > { %v1476_v33 = vmax.f32 %v1460_v23, 0.0 }
 0x305   : > { %v1488_v26 = vpack.c.bf16 %v1476_v33, %v1475_v24 }
 0x306   : > { %v1409_v34 = vpop.f32.mrf.mxu1 }
 0x307   : > { %1880 = vmatmul.msk.bf16.gmra.mxu2 %vm1212_vm6, %v1488_v26  ;;  %v1441_v57 = vmul.f32 %v3119_v27, %v1409_v34  ;;  %v2056_v34 = vld [vmem:[%s2626_s20 + $0x28] sm:$0xff] }
 0x309   : > { %v1461_v9 = vadd.f32 %v3126_v0, %v1441_v57 }
 0x30b   : > { %v1477_v7 = vmax.f32 %v1461_v9, 0.0 }
 0x30e   : > { %v1411_v62 = vpop.f32.mrf.mxu1 }
 0x30f   : > { %v1442_v5 = vmul.f32 %v3119_v27, %v1411_v62  ;;  %v1530_v32 = vpop.f32.mrf.mxu2 }
 0x310   : > { %v1574_v35 = vmul.f32 %v3169_v60, %v1530_v32 }
 0x311   : > { %v1462_v25 = vadd.f32 %v3126_v0, %v1442_v5 }
 0x312   : > { %v1594_v6 = vadd.f32 %v3174_v63, %v1574_v35 }
 0x313   : > { %v1478_v8 = vmax.f32 %v1462_v25, 0.0 }
 0x314   : > { %v1610_v11 = vadd.f32 %v2051_v10, %v1594_v6 }
 0x315   : > { %v1489_v43 = vpack.c.bf16 %v1478_v8, %v1477_v7 }
 0x316   : > { %v1626_v45 = vmax.f32 %v1610_v11, 0.0  ;;  %v1414_v49 = vpop.f32.mrf.mxu1 }
 0x317   : > { %v1532_v28 = vpop.f32.mrf.mxu2  ;;  %1881 = vmatmul.msk.bf16.gmra.mxu2 %vm1212_vm6, %v1489_v43  ;;  %v1443_v16 = vmul.f32 %v3119_v27, %v1414_v49  ;;  %v2057_v49 = vld [vmem:[%s2626_s20 + $0x30] sm:$0xff] }
 0x318   : > { %1642 = vst.msk [vmem:[%s3185_s18] sm:$0xff] %vm615_vm0, %v1626_v45  ;;  %v1575_v13 = vmul.f32 %v3169_v60, %v1532_v28 }
 0x319   : > { %v1463_v54 = vadd.f32 %v3126_v0, %v1443_v16  ;;  %v2058_v16 = vld [vmem:[%s2626_s20 + $0x38] sm:$0xff] }
 0x31a   : > { %v1595_v15 = vadd.f32 %v3174_v63, %v1575_v13 }
 0x31b   : > { %v1479_v59 = vmax.f32 %v1463_v54, 0.0 }
 0x31c   : > { %v1611_v18 = vadd.f32 %v2052_v17, %v1595_v15 }
 0x31e   : > { %v1627_v14 = vmax.f32 %v1611_v18, 0.0  ;;  %v1416_v38 = vpop.f32.mrf.mxu1 }
 0x31f   : > { %v1444_v21 = vmul.f32 %v3119_v27, %v1416_v38  ;;  %v1535_v12 = vpop.f32.mrf.mxu2 }
 0x320   : > { %1643 = vst.msk [vmem:[%s3185_s18 + $0x8] sm:$0xff] %vm615_vm0, %v1627_v14  ;;  %v1576_v61 = vmul.f32 %v3169_v60, %v1535_v12 }
 0x321   : > { %v1464_v19 = vadd.f32 %v3126_v0, %v1444_v21  ;;  %v2059_v21 = vld [vmem:[%s2626_s20 + $0x40] sm:$0xff] }
 0x322   : > { %v1596_v20 = vadd.f32 %v3174_v63, %v1576_v61 }
 0x323   : > { %v1480_v36 = vmax.f32 %v1464_v19, 0.0 }
 0x324   : > { %v1612_v22 = vadd.f32 %v2053_v3, %v1596_v20 }
 0x325   : > { %v1490_v31 = vpack.c.bf16 %v1480_v36, %v1479_v59  ;;  %v2060_v36 = vld [vmem:[%s2626_s20 + $0x48] sm:$0xff] }
 0x326   : > { %v1628_v41 = vmax.f32 %v1612_v22, 0.0  ;;  %v1419_v40 = vpop.f32.mrf.mxu1 }
 0x327   : > { %v1537_v42 = vpop.f32.mrf.mxu2  ;;  %1882 = vmatmul.msk.bf16.gmra.mxu2 %vm1212_vm6, %v1490_v31  ;;  %v1445_v58 = vmul.f32 %v3119_v27, %v1419_v40 }
 0x328   : > { %1644 = vst.msk [vmem:[%s3185_s18 + $0x10] sm:$0xff] %vm615_vm0, %v1628_v41  ;;  %v1577_v53 = vmul.f32 %v3169_v60, %v1537_v42  ;;  %v2061_v42 = vld [vmem:[%s2626_s20 + $0x50] sm:$0xff] }
 0x329   : > { %v1465_v50 = vadd.f32 %v3126_v0, %v1445_v58 }
 0x32a   : > { %v1597_v56 = vadd.f32 %v3174_v63, %v1577_v53 }
 0x32b   : > { %v1481_v4 = vmax.f32 %v1465_v50, 0.0 }
 0x32c   : > { %v1613_v46 = vadd.f32 %v2054_v44, %v1597_v56 }
 0x32e   : > { %v1629_v39 = vmax.f32 %v1613_v46, 0.0  ;;  %v1421_v48 = vpop.f32.mrf.mxu1 }
 0x32f   : > { %v1446_v1 = vmul.f32 %v3119_v27, %v1421_v48 }
 0x330   : > { %1645 = vst.msk [vmem:[%s3185_s18 + $0x18] sm:$0xff] %vm615_vm0, %v1629_v39  ;;  %v2062_v39 = vld [vmem:[%s2626_s20 + $0x58] sm:$0xff] }
 0x331   : > { %v1466_v2 = vadd.f32 %v3126_v0, %v1446_v1 }
 0x333   : > { %v1482_v51 = vmax.f32 %v1466_v2, 0.0 }
 0x335   : > { %v1491_v52 = vpack.c.bf16 %v1482_v51, %v1481_v4  ;;  %v2063_v51 = vld [vmem:[%s2626_s20 + $0x60] sm:$0xff] }
 0x337   : > { %1883 = vmatmul.msk.bf16.gmra.mxu2 %vm1212_vm6, %v1491_v52 }
 0x33e   : > { %v1540_v30 = vpop.f32.mrf.mxu2 }
 0x33f   : > { %v1578_v47 = vmul.f32 %v3169_v60, %v1540_v30 }
 0x341   : > { %v1598_v37 = vadd.f32 %v3174_v63, %v1578_v47 }
 0x343   : > { %v1614_v29 = vadd.f32 %v2055_v55, %v1598_v37 }
 0x345   : > { %v1630_v23 = vmax.f32 %v1614_v29, 0.0  ;;  %v2064_v29 = vld [vmem:[%s2626_s20 + $0x68] sm:$0xff] }
 0x346   : > { %v1542_v24 = vpop.f32.mrf.mxu2 }
 0x347   : > { %1646 = vst.msk [vmem:[%s3185_s18 + $0x20] sm:$0xff] %vm615_vm0, %v1630_v23  ;;  %v1579_v33 = vmul.f32 %v3169_v60, %v1542_v24 }
 0x349   : > { %v1599_v26 = vadd.f32 %v3174_v63, %v1579_v33 }
 0x34b   : > { %v1615_v57 = vadd.f32 %v2056_v34, %v1599_v26 }
 0x34d   : > { %v1631_v62 = vmax.f32 %v1615_v57, 0.0  ;;  %v2065_v57 = vld [vmem:[%s2626_s20 + $0x70] sm:$0xff] }
 0x34f   : > { %1647 = vst.msk [vmem:[%s3185_s18 + $0x28] sm:$0xff] %vm615_vm0, %v1631_v62 }
 0x378   : > { %v1424_v9 = vpop.f32.mrf.mxu3 }
 0x379   : > { %v1447_v5 = vmul.f32 %v3119_v27, %v1424_v9 }
 0x37b   : > { %v1467_v35 = vadd.f32 %v3126_v0, %v1447_v5 }
 0x37d   : > { %v1483_v7 = vmax.f32 %v1467_v35, 0.0 }
 0x380   : > { %v1426_v32 = vpop.f32.mrf.mxu3 }
 0x381   : > { %v1448_v25 = vmul.f32 %v3119_v27, %v1426_v32 }
 0x383   : > { %v1468_v6 = vadd.f32 %v3126_v0, %v1448_v25  ;;  %v2066_v25 = vld [vmem:[%s2626_s20 + $0x78] sm:$0xff] }
 0x385   : > { %v1484_v8 = vmax.f32 %v1468_v6, 0.0 }
 0x387   : > { %v1492_v10 = vpack.c.bf16 %v1484_v8, %v1483_v7 }
 0x389   : > { %1884 = vmatmul.msk.bf16.vlgmr.msra.gmra.mxu3 %vm1212_vm6, %v1492_v10 }
 0x38a   : > { %v1545_v11 = vpop.f32.mrf.mxu2 }
 0x38b   : > { %v1580_v43 = vmul.f32 %v3169_v60, %v1545_v11 }
 0x38d   : > { %v1600_v45 = vadd.f32 %v3174_v63, %v1580_v43 }
 0x38f   : > { %v1616_v28 = vadd.f32 %v2057_v49, %v1600_v45 }
 0x391   : > { %v1632_v13 = vmax.f32 %v1616_v28, 0.0 }
 0x392   : > { %v1547_v27 = vpop.f32.mrf.mxu2 }
 0x393   : > { %1648 = vst.msk [vmem:[%s3185_s18 + $0x30] sm:$0xff] %vm615_vm0, %v1632_v13  ;;  %v1581_v0 = vmul.f32 %v3169_v60, %v1547_v27 }
 0x395   : > { %v1601_v15 = vadd.f32 %v3174_v63, %v1581_v0 }
 0x397   : > { %v1617_v17 = vadd.f32 %v2058_v16, %v1601_v15 }
 0x399   : > { %v1633_v18 = vmax.f32 %v1617_v17, 0.0 }
 0x39a   : > { %v1550_v14 = vpop.f32.mrf.mxu2 }
 0x39b   : > { %1649 = vst.msk [vmem:[%s3185_s18 + $0x38] sm:$0xff] %vm615_vm0, %v1633_v18  ;;  %v1582_v38 = vmul.f32 %v3169_v60, %v1550_v14 }
 0x39d   : > { %v1602_v54 = vadd.f32 %v3174_v63, %v1582_v38 }
 0x39f   : > { %v1618_v12 = vadd.f32 %v2059_v21, %v1602_v54 }
 0x3a1   : > { %v1634_v61 = vmax.f32 %v1618_v12, 0.0 }
 0x3a2   : > { %v1552_v19 = vpop.f32.mrf.mxu2 }
 0x3a3   : > { %1650 = vst.msk [vmem:[%s3185_s18 + $0x40] sm:$0xff] %vm615_vm0, %v1634_v61  ;;  %v1583_v20 = vmul.f32 %v3169_v60, %v1552_v19 }
 0x3a5   : > { %v1603_v59 = vadd.f32 %v3174_v63, %v1583_v20 }
 0x3a7   : > { %v1619_v3 = vadd.f32 %v2060_v36, %v1603_v59 }
 0x3a9   : > { %v1635_v22 = vmax.f32 %v1619_v3, 0.0 }
 0x3aa   : > { %v1555_v31 = vpop.f32.mrf.mxu2 }
 0x3ab   : > { %1651 = vst.msk [vmem:[%s3185_s18 + $0x48] sm:$0xff] %vm615_vm0, %v1635_v22  ;;  %v1584_v41 = vmul.f32 %v3169_v60, %v1555_v31 }
 0x3ad   : > { %v1604_v40 = vadd.f32 %v3174_v63, %v1584_v41 }
 0x3af   : > { %v1620_v53 = vadd.f32 %v2061_v42, %v1604_v40 }
 0x3b1   : > { %v1636_v56 = vmax.f32 %v1620_v53, 0.0 }
 0x3b2   : > { %v1557_v58 = vpop.f32.mrf.mxu2 }
 0x3b3   : > { %1652 = vst.msk [vmem:[%s3185_s18 + $0x50] sm:$0xff] %vm615_vm0, %v1636_v56  ;;  %v1585_v44 = vmul.f32 %v3169_v60, %v1557_v58 }
 0x3b5   : > { %v1605_v46 = vadd.f32 %v3174_v63, %v1585_v44 }
 0x3b7   : > { %v1621_v48 = vadd.f32 %v2062_v39, %v1605_v46 }
 0x3b9   : > { %v1637_v50 = vmax.f32 %v1621_v48, 0.0 }
 0x3ba   : > { %v1560_v1 = vpop.f32.mrf.mxu2 }
 0x3bb   : > { %1653 = vst.msk [vmem:[%s3185_s18 + $0x58] sm:$0xff] %vm615_vm0, %v1637_v50  ;;  %v1586_v2 = vmul.f32 %v3169_v60, %v1560_v1 }
 0x3bd   : > { %v1606_v4 = vadd.f32 %v3174_v63, %v1586_v2 }
 0x3bf   : > { %v1622_v52 = vadd.f32 %v2063_v51, %v1606_v4 }
 0x3c1   : > { %v1638_v30 = vmax.f32 %v1622_v52, 0.0 }
 0x3c2   : > { %v1562_v47 = vpop.f32.mrf.mxu2 }
 0x3c3   : > { %1654 = vst.msk [vmem:[%s3185_s18 + $0x60] sm:$0xff] %vm615_vm0, %v1638_v30  ;;  %v1587_v37 = vmul.f32 %v3169_v60, %v1562_v47 }
 0x3c5   : > { %v1607_v55 = vadd.f32 %v3174_v63, %v1587_v37 }
 0x3c7   : > { %v1623_v23 = vadd.f32 %v2064_v29, %v1607_v55 }
 0x3c9   : > { %v1639_v24 = vmax.f32 %v1623_v23, 0.0 }
 0x3cb   : > { %1655 = vst.msk [vmem:[%s3185_s18 + $0x68] sm:$0xff] %vm615_vm0, %v1639_v24 }
 0x40c   : > { %v1565_v33 = vpop.f32.mrf.mxu3 }
 0x40d   : > { %v1588_v26 = vmul.f32 %v3169_v60, %v1565_v33 }
 0x40f   : > { %v1608_v34 = vadd.f32 %v3174_v63, %v1588_v26 }
 0x411   : > { %v1624_v62 = vadd.f32 %v2065_v57, %v1608_v34 }
 0x413   : > { %v1640_v9 = vmax.f32 %v1624_v62, 0.0 }
 0x414   : > { %v1567_v5 = vpop.f32.mrf.mxu3 }
 0x415   : > { %1656 = vst.msk [vmem:[%s3185_s18 + $0x70] sm:$0xff] %vm615_vm0, %v1640_v9  ;;  %v1589_v32 = vmul.f32 %v3169_v60, %v1567_v5 }
 0x417   : > { %v1609_v35 = vadd.f32 %v3174_v63, %v1589_v32 }
 0x419   : > { %v1625_v6 = vadd.f32 %v2066_v25, %v1609_v35 }
 0x41b   : > { %v1641_v7 = vmax.f32 %v1625_v6, 0.0 }
 0x41d   : > { %1657 = vst.msk [vmem:[%s3185_s18 + $0x78] sm:$0xff] %vm615_vm0, %v1641_v7 }
 0x41e   : > { %2184 = shalt.err (!%p2181_p12)
}
 0x41f   : > { %s2319_s19 = smov 128  }
 0x420   : > { %1908 = dma.vmem_to_hbm [thread:$0]  (%p2556_p4), %s1675_s1, 2048, %s1677_s0, %s1659_s14, %s2319_s19, %s2319_s19, %s2316_s27  }
 0x421 PF: > { %s3434_s18 = sld [smem:[#allocation14_spill]]  ;;  %p1925_p13 = scmp.ge.s32.totalorder %s2311_s16, 2 }
 0x423   : > { %p1921_p1 = pnand %p1925_p13, %p2560_p6 }
 0x425   : > { %p1922_p2 = pneg %p1921_p1 }
 0x427   : > { %s1691_s21 = sand.u32 1, %s3434_s18  }
 0x428   : > { %s1692_s10 = scalar_lea.sflag [#allocation4], %s1691_s21 }
 0x429   : > { %2254 = dma.done.wait (%p1922_p2), %s1692_s10, 2048  }
 0x42a   : > { %2256 = vsyncadd (%p1922_p2), %s1692_s10, 4294965248  ;;  %s31_s16 = sadd.s32 1, %s2311_s16   ;;  %s3437_s7 = sld [smem:[#allocation13_spill]] }
 0x42b   : > { %p3302_p11 = scmp.ge.s32.totalorder %s31_s16, 6   ;;  %s3438_s26 = sld [smem:[#allocation23_spill]] }
 0x42c   : > { %s3439_s30 = sld [smem:[#allocation15_spill]]  ;;  %s3446_s21 = smov %s2263_s22 }
 0x42d   : > { %s3440_s29 = sld [smem:[#allocation24_spill]]  ;;  %s3447_s22 = smov %s2267_s23 }
 0x42e   : > { %s3441_s15 = sld [smem:[#allocation18_spill]]  ;;  %s3448_s23 = smov %s2603_s11 }
 0x42f   : > { %s3442_s13 = sld [smem:[#allocation19_spill]]  ;;  %s3449_s24 = smov %s2275_s25 }
 0x430   : > { %s3443_s14 = sld [smem:[#allocation20_spill]]  ;;  %s3450_s25 = smov %s3437_s7 }
 0x431   : > { %s3444_s3 = sld [smem:[#allocation21_spill]]  ;;  %s3451_s27 = smov %s2287_s28 }
 0x432   : > { %s3452_s28 = smov %s3439_s30 }
 0x433   :  { %30 = sbr.rel (!%p3302_p11) target bundleno = 25 (0x19), region = 137 }
 0x434   : > { %s3453_s30 = smov %s3441_s15 }
 0x437   : > { %s3454_s15 = smov %s3444_s3 }
 0x438   :  { %1698 = vsyncpa [#allocation3], 1 }
 0x439   :  { %1700 = vsyncpa [#allocation3 + $0x1], 1 }
 0x43a   :  { %1701 = vsyncpa [#allocation6], 1 }
 0x43b   :  { %1703 = vsyncpa [#allocation6 + $0x1], 1 }
 0x43c   :  { %1704 = vsyncpa [#allocation4], 1 }
 0x43d   :  { %1706 = vsyncpa [#allocation4 + $0x1], 1 }

</bundles_post_ra>
